<compile_context>
chip_gen: v7x
topology: tpu7x:2x2x1
jax: 0.10.0
libtpu: 0.0.40
codegen_flags: <defaults>
</compile_context>

<pallas_src>
import functools

import jax
import jax.numpy as jnp
from jax.experimental import pallas as pl
from jax.experimental.pallas import tpu as pltpu


def _rmsnorm(x, w, b, eps=1e-8):
    # RMSLayerNorm: w * (x / (sqrt(mean(x^2, -1)) + eps)) + b
    ms = jnp.mean(x * x, axis=-1, keepdims=True)
    inv = pl.reciprocal(jnp.sqrt(ms) + eps, approx=True)   # EUP slot (≈ free)
    return w * (x * inv) + b


def block_kernel(x_ref, wq_ref, wkv_ref, wo_ref, w1_ref, w2_ref,
                 ln1w_ref, ln1b_ref, ln2w_ref, ln2b_ref, o_ref,
                 *, num_head, head_dim, hidden_size, q_block):
    H = hidden_size
    S = x_ref.shape[1]
    d = head_dim

    qi = pl.program_id(1)
    q_start = pl.multiple_of(qi * q_block, q_block)

    ln1_w = ln1w_ref[...]            # (1, H) f32
    ln1_b = ln1b_ref[...]
    ln2_w = ln2w_ref[...]
    ln2_b = ln2b_ref[...]

    x_full = x_ref[0]                              # (S, H) f32
    h_full = _rmsnorm(x_full, ln1_w, ln1_b)        # needed for K/V over the whole prefix

    if q_block == S:                 # single query tile: reuse the full-row work
        x_q = x_full
        h_q = h_full
    else:                            # multi-tile: slice the query rows from the ref
        x_q = x_ref[0, pl.ds(q_start, q_block), :]           # (q_block, H)
        h_q = _rmsnorm(x_q, ln1_w, ln1_b)

    # ---- projections: bf16 operands, f32 accumulation on the MXU ----
    # NOTE: PyTorch scales scores by 1/sqrt(hidden_size), not 1/sqrt(head_dim).
    scale = jnp.float32(1.0 / (hidden_size ** 0.5))
    q = jnp.dot(h_q.astype(jnp.bfloat16), wq_ref[...],
                preferred_element_type=jnp.float32)           # (q_block, H)
    kv = jnp.dot(h_full.astype(jnp.bfloat16), wkv_ref[...],
                 preferred_element_type=jnp.float32)          # (S, 2H) = [K | V]

    q_bf = (q * scale).astype(jnp.bfloat16)
    kv_bf = kv.astype(jnp.bfloat16)

    # causal mask, hoisted out of the head loop (2-D iota: TPU requirement)
    row = q_start + jax.lax.broadcasted_iota(jnp.int32, (q_block, S), 0)
    col = jax.lax.broadcasted_iota(jnp.int32, (q_block, S), 1)
    causal = col <= row
    neg_fill = jnp.float32(jnp.finfo(jnp.float32).min)

    # acc = x_q + sum_h softmax(q_h k_h^T) v_h @ Wo_h   (== residual + W_o(concat heads))
    acc = x_q
    for hd in range(num_head):       # unrolled: num_head is small and static
        lo = hd * d
        q_h = q_bf[:, lo:lo + d]                   # (q_block, d)
        k_h = kv_bf[:, lo:lo + d]                  # (S, d)
        v_h = kv_bf[:, H + lo:H + lo + d]          # (S, d)
        s = jax.lax.dot_general(q_h, k_h, (((1,), (1,)), ((), ())),
                                preferred_element_type=jnp.float32)    # (q_block, S)
        s = jnp.where(causal, s, neg_fill)
        m = jnp.max(s, axis=-1, keepdims=True)
        p = jnp.exp(s - m)
        p = p * pl.reciprocal(jnp.sum(p, axis=-1, keepdims=True), approx=True)
        o_h = jnp.dot(p.astype(jnp.bfloat16), v_h,
                      preferred_element_type=jnp.float32)              # (q_block, d)
        acc = acc + jnp.dot(o_h.astype(jnp.bfloat16), wo_ref[hd],
                            preferred_element_type=jnp.float32)        # (q_block, H)

    h1 = acc                                        # residual 1

    # ---- ln_2 + FFN ----
    g = _rmsnorm(h1, ln2_w, ln2_b)
    f = jnp.dot(g.astype(jnp.bfloat16), w1_ref[...],
                preferred_element_type=jnp.float32)                    # (q_block, 4H)
    f = jnp.maximum(f, 0.0)
    f = jnp.dot(f.astype(jnp.bfloat16), w2_ref[...],
                preferred_element_type=jnp.float32)                    # (q_block, H)

    o_ref[0] = (h1 + f).astype(o_ref.dtype)         # single lane-dense store


def _pick_q_block(S):
    for cand in (512, 256, 128):
        if S % cand == 0:
            return cand
    return S


def block_forward(x, params, *, num_head, q_block_size=None):
    """x: (B, S, H) float32. params: f32 weights in (in_features, out_features) layout."""
    B, S, H = x.shape
    head_dim = H // num_head
    if q_block_size is None:
        q_block_size = _pick_q_block(S)
    assert S % q_block_size == 0
    nq = S // q_block_size

    # Host-side weight prep (free): bf16 weights halve DMA + VMEM. K and V are
    # fused into one (H, 2H) weight; W_o is reshaped head-major so the kernel
    # folds the head-merge into per-head accumulations (no concat).
    wq = params["wq"].astype(jnp.bfloat16)
    wkv = jnp.concatenate([params["wk"], params["wv"]], axis=1).astype(jnp.bfloat16)
    wo3 = params["wo"].reshape(num_head, head_dim, H).astype(jnp.bfloat16)
    w1 = params["w1"].astype(jnp.bfloat16)
    w2 = params["w2"].astype(jnp.bfloat16)

    kernel = functools.partial(
        block_kernel, num_head=num_head, head_dim=head_dim,
        hidden_size=H, q_block=q_block_size)

    def invariant(shape):
        zeros = (0,) * len(shape)
        return pl.BlockSpec(shape, lambda b, qi: zeros)

    return pl.pallas_call(
        kernel,
        out_shape=jax.ShapeDtypeStruct((B, S, H), x.dtype),
        grid_spec=pltpu.PrefetchScalarGridSpec(
            num_scalar_prefetch=0,
            grid=(B, nq),
            in_specs=[
                pl.BlockSpec((1, S, H), lambda b, qi: (b, 0, 0)),  # x (full rows: K/V)
                invariant((H, H)),                    # wq
                invariant((H, 2 * H)),                # fused [wk | wv]
                invariant((num_head, head_dim, H)),   # wo, head-major
                invariant((H, 4 * H)),                # mlp_1
                invariant((4 * H, H)),                # mlp_2
                invariant((1, H)),                    # ln1 weight
                invariant((1, H)),                    # ln1 bias
                invariant((1, H)),                    # ln2 weight
                invariant((1, H)),                    # ln2 bias
            ],
            out_specs=pl.BlockSpec((1, q_block_size, H), lambda b, qi: (b, qi, 0)),
        ),
        compiler_params=pltpu.CompilerParams(
            dimension_semantics=("parallel", "parallel"),
            vmem_limit_bytes=64 * 1024 * 1024),
    )(x, wq, wkv, wo3, w1, w2,
      params["ln1_w"], params["ln1_b"], params["ln2_w"], params["ln2_b"])


def reference_forward(x, params, *, num_head):
    """Pure-JAX (f32) replica of the PyTorch Block.forward for verification."""
    B, S, H = x.shape
    d = H // num_head
    eps = 1e-8

    def rmsnorm(v, w, b):
        rms = jnp.sqrt(jnp.mean(v * v, axis=-1, keepdims=True))
        return w * (v / (rms + eps)) + b

    h = rmsnorm(x, params["ln1_w"][0], params["ln1_b"][0])
    q = h @ params["wq"]
    k = h @ params["wk"]
    v = h @ params["wv"]

    def split(t):
        return t.reshape(B, S, num_head, d).transpose(0, 2, 1, 3)

    q, k, v = split(q), split(k), split(v)
    attn = jnp.einsum("bhqd,bhkd->bhqk", q, k) / (H ** 0.5)
    mask = jnp.tril(jnp.ones((S, S), dtype=bool))
    attn = jnp.where(mask[None, None], attn, jnp.finfo(jnp.float32).min)
    attn = jax.nn.softmax(attn, axis=-1)
    o = jnp.einsum("bhqk,bhkd->bhqd", attn, v)
    o = o.transpose(0, 2, 1, 3).reshape(B, S, H)
    o = o @ params["wo"]
    h1 = x + o

    g = rmsnorm(h1, params["ln2_w"][0], params["ln2_b"][0])
    f = jnp.maximum(g @ params["w1"], 0.0) @ params["w2"]
    return h1 + f


if __name__ == "__main__":
    B, S, H, NUM_HEAD = 2, 8, 32, 4

    key = jax.random.PRNGKey(0)
    keys = jax.random.split(key, 8)
    scale = 0.02

    # nn.Linear(H, H, bias=False) weight is (out, in); these are the transposed
    # (in, out) forms so the kernel computes x @ W directly.
    params = {
        "wq": scale * jax.random.normal(keys[0], (H, H), jnp.float32),
        "wk": scale * jax.random.normal(keys[1], (H, H), jnp.float32),
        "wv": scale * jax.random.normal(keys[2], (H, H), jnp.float32),
        "wo": scale * jax.random.normal(keys[3], (H, H), jnp.float32),
        "w1": scale * jax.random.normal(keys[4], (H, 4 * H), jnp.float32),
        "w2": scale * jax.random.normal(keys[5], (4 * H, H), jnp.float32),
        "ln1_w": jnp.ones((1, H), jnp.float32),
        "ln1_b": jnp.zeros((1, H), jnp.float32),
        "ln2_w": jnp.ones((1, H), jnp.float32),
        "ln2_b": jnp.zeros((1, H), jnp.float32),
    }

    x = jax.random.normal(keys[6], (B, S, H), jnp.float32)

    out = block_forward(x, params, num_head=NUM_HEAD)
    out = jax.block_until_ready(out)

    ref = reference_forward(x, params, num_head=NUM_HEAD)
    assert out.shape == (B, S, H)
    # Tolerance loosened vs the pure-f32 reference because matmul operands are
    # bf16 (f32 accumulation) and the normalizers use approx reciprocals.
    max_err = float(jnp.max(jnp.abs(out - ref)))
    assert jnp.allclose(out, ref, atol=2e-2, rtol=2e-2), f"max abs err {max_err}"

    print("KERNEL_OK")
</pallas_src>

<mosaic_0001>
module attributes {stable_mosaic.version = 11 : i64} {
  func.func @block_kernel(%arg0: i32, %arg1: i32, %arg2: memref<1x8x32xf32, #tpu.memory_space<vmem>>, %arg3: memref<32x32xbf16, #tpu.memory_space<vmem>>, %arg4: memref<32x64xbf16, #tpu.memory_space<vmem>>, %arg5: memref<4x8x32xbf16, #tpu.memory_space<vmem>>, %arg6: memref<32x128xbf16, #tpu.memory_space<vmem>>, %arg7: memref<128x32xbf16, #tpu.memory_space<vmem>>, %arg8: memref<1x32xf32, #tpu.memory_space<vmem>>, %arg9: memref<1x32xf32, #tpu.memory_space<vmem>>, %arg10: memref<1x32xf32, #tpu.memory_space<vmem>>, %arg11: memref<1x32xf32, #tpu.memory_space<vmem>>, %arg12: memref<1x8x32xf32, #tpu.memory_space<vmem>>) attributes {dimension_semantics = [#tpu.dimension_semantics<parallel>, #tpu.dimension_semantics<parallel>], iteration_bounds = array<i64: 2, 1>, scalar_prefetch = 0 : i64, scratch_operands = 0 : i64, tpu.core_type = #tpu.core_type<tc>, window_params = [{transform_indices = @transform_0, window_bounds = array<i64: 1, 8, 32>}, {pipeline_mode = #tpu.pipeline_mode<synchronous>, transform_indices = @transform_1, window_bounds = array<i64: 32, 32>}, {pipeline_mode = #tpu.pipeline_mode<synchronous>, transform_indices = @transform_2, window_bounds = array<i64: 32, 64>}, {pipeline_mode = #tpu.pipeline_mode<synchronous>, transform_indices = @transform_3, window_bounds = array<i64: 4, 8, 32>}, {pipeline_mode = #tpu.pipeline_mode<synchronous>, transform_indices = @transform_4, window_bounds = array<i64: 32, 128>}, {pipeline_mode = #tpu.pipeline_mode<synchronous>, transform_indices = @transform_5, window_bounds = array<i64: 128, 32>}, {pipeline_mode = #tpu.pipeline_mode<synchronous>, transform_indices = @transform_6, window_bounds = array<i64: 1, 32>}, {pipeline_mode = #tpu.pipeline_mode<synchronous>, transform_indices = @transform_7, window_bounds = array<i64: 1, 32>}, {pipeline_mode = #tpu.pipeline_mode<synchronous>, transform_indices = @transform_8, window_bounds = array<i64: 1, 32>}, {pipeline_mode = #tpu.pipeline_mode<synchronous>, transform_indices = @transform_9, window_bounds = array<i64: 1, 32>}, {transform_indices = @transform_10, window_bounds = array<i64: 1, 8, 32>}]} {
    %c8_i32 = arith.constant 8 : i32
    %0 = arith.muli %arg1, %c8_i32 : i32
    %1 = tpu.assume_multiple %0, 8 : i32
    %c0 = arith.constant 0 : index
    %c0_0 = arith.constant 0 : index
    %2 = vector.load %arg8[%c0, %c0_0] : memref<1x32xf32, #tpu.memory_space<vmem>>, vector<1x32xf32>
    %c0_1 = arith.constant 0 : index
    %c0_2 = arith.constant 0 : index
    %3 = vector.load %arg9[%c0_1, %c0_2] : memref<1x32xf32, #tpu.memory_space<vmem>>, vector<1x32xf32>
    %c0_3 = arith.constant 0 : index
    %c0_4 = arith.constant 0 : index
    %4 = vector.load %arg10[%c0_3, %c0_4] : memref<1x32xf32, #tpu.memory_space<vmem>>, vector<1x32xf32>
    %c0_5 = arith.constant 0 : index
    %c0_6 = arith.constant 0 : index
    %5 = vector.load %arg11[%c0_5, %c0_6] : memref<1x32xf32, #tpu.memory_space<vmem>>, vector<1x32xf32>
    %c0_7 = arith.constant 0 : index
    %c0_8 = arith.constant 0 : index
    %c0_9 = arith.constant 0 : index
    %6 = vector.load %arg2[%c0_7, %c0_8, %c0_9] : memref<1x8x32xf32, #tpu.memory_space<vmem>>, vector<1x8x32xf32>
    %7 = vector.shape_cast %6 : vector<1x8x32xf32> to vector<8x32xf32>
    %8 = arith.mulf %7, %7 : vector<8x32xf32>
    %cst = arith.constant dense<0.000000e+00> : vector<8xf32>
    %9 = vector.multi_reduction <add>, %8, %cst [1] : vector<8x32xf32> to vector<8xf32>
    %10 = vector.shape_cast %9 : vector<8xf32> to vector<8x1xf32>
    %cst_10 = arith.constant 3.200000e+01 : f32
    %11 = vector.broadcast %cst_10 : f32 to vector<8x1xf32>
    %12 = arith.divf %10, %11 : vector<8x1xf32>
    %13 = math.sqrt %12 : vector<8x1xf32>
    %cst_11 = arith.constant 9.99999993E-9 : f32
    %14 = vector.broadcast %cst_11 : f32 to vector<8x1xf32>
    %15 = arith.addf %13, %14 : vector<8x1xf32>
    %16 = tpu.reciprocal %15 {approx = true} : vector<8x1xf32> -> vector<8x1xf32>
    %17 = vector.broadcast %16 : vector<8x1xf32> to vector<8x32xf32>
    %18 = arith.mulf %7, %17 : vector<8x32xf32>
    %19 = vector.broadcast %2 : vector<1x32xf32> to vector<8x32xf32>
    %20 = arith.mulf %19, %18 : vector<8x32xf32>
    %21 = vector.broadcast %3 : vector<1x32xf32> to vector<8x32xf32>
    %22 = arith.addf %20, %21 : vector<8x32xf32>
    %23 = arith.truncf %22 : vector<8x32xf32> to vector<8x32xbf16>
    %c0_12 = arith.constant 0 : index
    %c0_13 = arith.constant 0 : index
    %24 = vector.load %arg3[%c0_12, %c0_13] : memref<32x32xbf16, #tpu.memory_space<vmem>>, vector<32x32xbf16>
    %cst_14 = arith.constant dense<0.000000e+00> : vector<8x32xf32>
    %25 = tpu.matmul %23, %24, %cst_14 {dimension_numbers = #tpu.dot_dimension_numbers<[1], [0], [0], [1], [0, 0, 1, 1], [], []>} : vector<8x32xbf16>, vector<32x32xbf16>, vector<8x32xf32> -> vector<8x32xf32>
    %26 = arith.truncf %22 : vector<8x32xf32> to vector<8x32xbf16>
    %c0_15 = arith.constant 0 : index
    %c0_16 = arith.constant 0 : index
    %27 = vector.load %arg4[%c0_15, %c0_16] : memref<32x64xbf16, #tpu.memory_space<vmem>>, vector<32x64xbf16>
    %cst_17 = arith.constant dense<0.000000e+00> : vector<8x64xf32>
    %28 = tpu.matmul %26, %27, %cst_17 {dimension_numbers = #tpu.dot_dimension_numbers<[1], [0], [0], [1], [0, 0, 1, 1], [], []>} : vector<8x32xbf16>, vector<32x64xbf16>, vector<8x64xf32> -> vector<8x64xf32>
    %cst_18 = arith.constant 0.176776692 : f32
    %29 = vector.broadcast %cst_18 : f32 to vector<8x32xf32>
    %30 = arith.mulf %25, %29 : vector<8x32xf32>
    %31 = arith.truncf %30 : vector<8x32xf32> to vector<8x32xbf16>
    %32 = arith.truncf %28 : vector<8x64xf32> to vector<8x64xbf16>
    %33 = tpu.iota {dimensions = array<i32: 0>} : vector<8x8xi32>
    %34 = vector.broadcast %1 : i32 to vector<8x8xi32>
    %35 = arith.addi %34, %33 : vector<8x8xi32>
    %36 = tpu.iota {dimensions = array<i32: 1>} : vector<8x8xi32>
    %37 = arith.cmpi sle, %36, %35 : vector<8x8xi32>
    %38 = vector.extract_strided_slice %31 {offsets = [0, 0], sizes = [8, 8], strides = [1, 1]} : vector<8x32xbf16> to vector<8x8xbf16>
    %39 = vector.extract_strided_slice %32 {offsets = [0, 0], sizes = [8, 8], strides = [1, 1]} : vector<8x64xbf16> to vector<8x8xbf16>
    %40 = vector.extract_strided_slice %32 {offsets = [0, 32], sizes = [8, 8], strides = [1, 1]} : vector<8x64xbf16> to vector<8x8xbf16>
    %cst_19 = arith.constant dense<0.000000e+00> : vector<8x8xf32>
    %41 = tpu.matmul %38, %39, %cst_19 {dimension_numbers = #tpu.dot_dimension_numbers<[1], [1], [0], [0], [0, 0, 1, 0], [], []>} : vector<8x8xbf16>, vector<8x8xbf16>, vector<8x8xf32> -> vector<8x8xf32>
    %cst_20 = arith.constant -3.40282347E+38 : f32
    %42 = vector.broadcast %cst_20 : f32 to vector<8x8xf32>
    %43 = arith.select %37, %41, %42 : vector<8x8xi1>, vector<8x8xf32>
    %cst_21 = arith.constant dense<0xFF800000> : vector<8xf32>
    %44 = vector.multi_reduction <maximumf>, %43, %cst_21 [1] : vector<8x8xf32> to vector<8xf32>
    %45 = vector.shape_cast %44 : vector<8xf32> to vector<8x1xf32>
    %46 = vector.broadcast %45 : vector<8x1xf32> to vector<8x8xf32>
    %47 = arith.subf %43, %46 : vector<8x8xf32>
    %48 = math.exp %47 : vector<8x8xf32>
    %cst_22 = arith.constant dense<0.000000e+00> : vector<8xf32>
    %49 = vector.multi_reduction <add>, %48, %cst_22 [1] : vector<8x8xf32> to vector<8xf32>
    %50 = vector.shape_cast %49 : vector<8xf32> to vector<8x1xf32>
    %51 = tpu.reciprocal %50 {approx = true} : vector<8x1xf32> -> vector<8x1xf32>
    %52 = vector.broadcast %51 : vector<8x1xf32> to vector<8x8xf32>
    %53 = arith.mulf %48, %52 : vector<8x8xf32>
    %54 = arith.truncf %53 : vector<8x8xf32> to vector<8x8xbf16>
    %cst_23 = arith.constant dense<0.000000e+00> : vector<8x8xf32>
    %55 = tpu.matmul %54, %40, %cst_23 {dimension_numbers = #tpu.dot_dimension_numbers<[1], [0], [0], [1], [0, 0, 1, 1], [], []>} : vector<8x8xbf16>, vector<8x8xbf16>, vector<8x8xf32> -> vector<8x8xf32>
    %56 = arith.truncf %55 : vector<8x8xf32> to vector<8x8xbf16>
    %c0_24 = arith.constant 0 : index
    %c0_25 = arith.constant 0 : index
    %c0_26 = arith.constant 0 : index
    %57 = vector.load %arg5[%c0_24, %c0_25, %c0_26] : memref<4x8x32xbf16, #tpu.memory_space<vmem>>, vector<1x8x32xbf16>
    %58 = vector.shape_cast %57 : vector<1x8x32xbf16> to vector<8x32xbf16>
    %cst_27 = arith.constant dense<0.000000e+00> : vector<8x32xf32>
    %59 = tpu.matmul %56, %58, %cst_27 {dimension_numbers = #tpu.dot_dimension_numbers<[1], [0], [0], [1], [0, 0, 1, 1], [], []>} : vector<8x8xbf16>, vector<8x32xbf16>, vector<8x32xf32> -> vector<8x32xf32>
    %60 = arith.addf %7, %59 : vector<8x32xf32>
    %61 = vector.extract_strided_slice %31 {offsets = [0, 8], sizes = [8, 8], strides = [1, 1]} : vector<8x32xbf16> to vector<8x8xbf16>
    %62 = vector.extract_strided_slice %32 {offsets = [0, 8], sizes = [8, 8], strides = [1, 1]} : vector<8x64xbf16> to vector<8x8xbf16>
    %63 = vector.extract_strided_slice %32 {offsets = [0, 40], sizes = [8, 8], strides = [1, 1]} : vector<8x64xbf16> to vector<8x8xbf16>
    %cst_28 = arith.constant dense<0.000000e+00> : vector<8x8xf32>
    %64 = tpu.matmul %61, %62, %cst_28 {dimension_numbers = #tpu.dot_dimension_numbers<[1], [1], [0], [0], [0, 0, 1, 0], [], []>} : vector<8x8xbf16>, vector<8x8xbf16>, vector<8x8xf32> -> vector<8x8xf32>
    %cst_29 = arith.constant -3.40282347E+38 : f32
    %65 = vector.broadcast %cst_29 : f32 to vector<8x8xf32>
    %66 = arith.select %37, %64, %65 : vector<8x8xi1>, vector<8x8xf32>
    %cst_30 = arith.constant dense<0xFF800000> : vector<8xf32>
    %67 = vector.multi_reduction <maximumf>, %66, %cst_30 [1] : vector<8x8xf32> to vector<8xf32>
    %68 = vector.shape_cast %67 : vector<8xf32> to vector<8x1xf32>
    %69 = vector.broadcast %68 : vector<8x1xf32> to vector<8x8xf32>
    %70 = arith.subf %66, %69 : vector<8x8xf32>
    %71 = math.exp %70 : vector<8x8xf32>
    %cst_31 = arith.constant dense<0.000000e+00> : vector<8xf32>
    %72 = vector.multi_reduction <add>, %71, %cst_31 [1] : vector<8x8xf32> to vector<8xf32>
    %73 = vector.shape_cast %72 : vector<8xf32> to vector<8x1xf32>
    %74 = tpu.reciprocal %73 {approx = true} : vector<8x1xf32> -> vector<8x1xf32>
    %75 = vector.broadcast %74 : vector<8x1xf32> to vector<8x8xf32>
    %76 = arith.mulf %71, %75 : vector<8x8xf32>
    %77 = arith.truncf %76 : vector<8x8xf32> to vector<8x8xbf16>
    %cst_32 = arith.constant dense<0.000000e+00> : vector<8x8xf32>
    %78 = tpu.matmul %77, %63, %cst_32 {dimension_numbers = #tpu.dot_dimension_numbers<[1], [0], [0], [1], [0, 0, 1, 1], [], []>} : vector<8x8xbf16>, vector<8x8xbf16>, vector<8x8xf32> -> vector<8x8xf32>
    %79 = arith.truncf %78 : vector<8x8xf32> to vector<8x8xbf16>
    %c1 = arith.constant 1 : index
    %c0_33 = arith.constant 0 : index
    %c0_34 = arith.constant 0 : index
    %80 = vector.load %arg5[%c1, %c0_33, %c0_34] : memref<4x8x32xbf16, #tpu.memory_space<vmem>>, vector<1x8x32xbf16>
    %81 = vector.shape_cast %80 : vector<1x8x32xbf16> to vector<8x32xbf16>
    %cst_35 = arith.constant dense<0.000000e+00> : vector<8x32xf32>
    %82 = tpu.matmul %79, %81, %cst_35 {dimension_numbers = #tpu.dot_dimension_numbers<[1], [0], [0], [1], [0, 0, 1, 1], [], []>} : vector<8x8xbf16>, vector<8x32xbf16>, vector<8x32xf32> -> vector<8x32xf32>
    %83 = arith.addf %60, %82 : vector<8x32xf32>
    %84 = vector.extract_strided_slice %31 {offsets = [0, 16], sizes = [8, 8], strides = [1, 1]} : vector<8x32xbf16> to vector<8x8xbf16>
    %85 = vector.extract_strided_slice %32 {offsets = [0, 16], sizes = [8, 8], strides = [1, 1]} : vector<8x64xbf16> to vector<8x8xbf16>
    %86 = vector.extract_strided_slice %32 {offsets = [0, 48], sizes = [8, 8], strides = [1, 1]} : vector<8x64xbf16> to vector<8x8xbf16>
    %cst_36 = arith.constant dense<0.000000e+00> : vector<8x8xf32>
    %87 = tpu.matmul %84, %85, %cst_36 {dimension_numbers = #tpu.dot_dimension_numbers<[1], [1], [0], [0], [0, 0, 1, 0], [], []>} : vector<8x8xbf16>, vector<8x8xbf16>, vector<8x8xf32> -> vector<8x8xf32>
    %cst_37 = arith.constant -3.40282347E+38 : f32
    %88 = vector.broadcast %cst_37 : f32 to vector<8x8xf32>
    %89 = arith.select %37, %87, %88 : vector<8x8xi1>, vector<8x8xf32>
    %cst_38 = arith.constant dense<0xFF800000> : vector<8xf32>
    %90 = vector.multi_reduction <maximumf>, %89, %cst_38 [1] : vector<8x8xf32> to vector<8xf32>
    %91 = vector.shape_cast %90 : vector<8xf32> to vector<8x1xf32>
    %92 = vector.broadcast %91 : vector<8x1xf32> to vector<8x8xf32>
    %93 = arith.subf %89, %92 : vector<8x8xf32>
    %94 = math.exp %93 : vector<8x8xf32>
    %cst_39 = arith.constant dense<0.000000e+00> : vector<8xf32>
    %95 = vector.multi_reduction <add>, %94, %cst_39 [1] : vector<8x8xf32> to vector<8xf32>
    %96 = vector.shape_cast %95 : vector<8xf32> to vector<8x1xf32>
    %97 = tpu.reciprocal %96 {approx = true} : vector<8x1xf32> -> vector<8x1xf32>
    %98 = vector.broadcast %97 : vector<8x1xf32> to vector<8x8xf32>
    %99 = arith.mulf %94, %98 : vector<8x8xf32>
    %100 = arith.truncf %99 : vector<8x8xf32> to vector<8x8xbf16>
    %cst_40 = arith.constant dense<0.000000e+00> : vector<8x8xf32>
    %101 = tpu.matmul %100, %86, %cst_40 {dimension_numbers = #tpu.dot_dimension_numbers<[1], [0], [0], [1], [0, 0, 1, 1], [], []>} : vector<8x8xbf16>, vector<8x8xbf16>, vector<8x8xf32> -> vector<8x8xf32>
    %102 = arith.truncf %101 : vector<8x8xf32> to vector<8x8xbf16>
    %c2 = arith.constant 2 : index
    %c0_41 = arith.constant 0 : index
    %c0_42 = arith.constant 0 : index
    %103 = vector.load %arg5[%c2, %c0_41, %c0_42] : memref<4x8x32xbf16, #tpu.memory_space<vmem>>, vector<1x8x32xbf16>
    %104 = vector.shape_cast %103 : vector<1x8x32xbf16> to vector<8x32xbf16>
    %cst_43 = arith.constant dense<0.000000e+00> : vector<8x32xf32>
    %105 = tpu.matmul %102, %104, %cst_43 {dimension_numbers = #tpu.dot_dimension_numbers<[1], [0], [0], [1], [0, 0, 1, 1], [], []>} : vector<8x8xbf16>, vector<8x32xbf16>, vector<8x32xf32> -> vector<8x32xf32>
    %106 = arith.addf %83, %105 : vector<8x32xf32>
    %107 = vector.extract_strided_slice %31 {offsets = [0, 24], sizes = [8, 8], strides = [1, 1]} : vector<8x32xbf16> to vector<8x8xbf16>
    %108 = vector.extract_strided_slice %32 {offsets = [0, 24], sizes = [8, 8], strides = [1, 1]} : vector<8x64xbf16> to vector<8x8xbf16>
    %109 = vector.extract_strided_slice %32 {offsets = [0, 56], sizes = [8, 8], strides = [1, 1]} : vector<8x64xbf16> to vector<8x8xbf16>
    %cst_44 = arith.constant dense<0.000000e+00> : vector<8x8xf32>
    %110 = tpu.matmul %107, %108, %cst_44 {dimension_numbers = #tpu.dot_dimension_numbers<[1], [1], [0], [0], [0, 0, 1, 0], [], []>} : vector<8x8xbf16>, vector<8x8xbf16>, vector<8x8xf32> -> vector<8x8xf32>
    %cst_45 = arith.constant -3.40282347E+38 : f32
    %111 = vector.broadcast %cst_45 : f32 to vector<8x8xf32>
    %112 = arith.select %37, %110, %111 : vector<8x8xi1>, vector<8x8xf32>
    %cst_46 = arith.constant dense<0xFF800000> : vector<8xf32>
    %113 = vector.multi_reduction <maximumf>, %112, %cst_46 [1] : vector<8x8xf32> to vector<8xf32>
    %114 = vector.shape_cast %113 : vector<8xf32> to vector<8x1xf32>
    %115 = vector.broadcast %114 : vector<8x1xf32> to vector<8x8xf32>
    %116 = arith.subf %112, %115 : vector<8x8xf32>
    %117 = math.exp %116 : vector<8x8xf32>
    %cst_47 = arith.constant dense<0.000000e+00> : vector<8xf32>
    %118 = vector.multi_reduction <add>, %117, %cst_47 [1] : vector<8x8xf32> to vector<8xf32>
    %119 = vector.shape_cast %118 : vector<8xf32> to vector<8x1xf32>
    %120 = tpu.reciprocal %119 {approx = true} : vector<8x1xf32> -> vector<8x1xf32>
    %121 = vector.broadcast %120 : vector<8x1xf32> to vector<8x8xf32>
    %122 = arith.mulf %117, %121 : vector<8x8xf32>
    %123 = arith.truncf %122 : vector<8x8xf32> to vector<8x8xbf16>
    %cst_48 = arith.constant dense<0.000000e+00> : vector<8x8xf32>
    %124 = tpu.matmul %123, %109, %cst_48 {dimension_numbers = #tpu.dot_dimension_numbers<[1], [0], [0], [1], [0, 0, 1, 1], [], []>} : vector<8x8xbf16>, vector<8x8xbf16>, vector<8x8xf32> -> vector<8x8xf32>
    %125 = arith.truncf %124 : vector<8x8xf32> to vector<8x8xbf16>
    %c3 = arith.constant 3 : index
    %c0_49 = arith.constant 0 : index
    %c0_50 = arith.constant 0 : index
    %126 = vector.load %arg5[%c3, %c0_49, %c0_50] : memref<4x8x32xbf16, #tpu.memory_space<vmem>>, vector<1x8x32xbf16>
    %127 = vector.shape_cast %126 : vector<1x8x32xbf16> to vector<8x32xbf16>
    %cst_51 = arith.constant dense<0.000000e+00> : vector<8x32xf32>
    %128 = tpu.matmul %125, %127, %cst_51 {dimension_numbers = #tpu.dot_dimension_numbers<[1], [0], [0], [1], [0, 0, 1, 1], [], []>} : vector<8x8xbf16>, vector<8x32xbf16>, vector<8x32xf32> -> vector<8x32xf32>
    %129 = arith.addf %106, %128 : vector<8x32xf32>
    %130 = arith.mulf %129, %129 : vector<8x32xf32>
    %cst_52 = arith.constant dense<0.000000e+00> : vector<8xf32>
    %131 = vector.multi_reduction <add>, %130, %cst_52 [1] : vector<8x32xf32> to vector<8xf32>
    %132 = vector.shape_cast %131 : vector<8xf32> to vector<8x1xf32>
    %cst_53 = arith.constant 3.200000e+01 : f32
    %133 = vector.broadcast %cst_53 : f32 to vector<8x1xf32>
    %134 = arith.divf %132, %133 : vector<8x1xf32>
    %135 = math.sqrt %134 : vector<8x1xf32>
    %cst_54 = arith.constant 9.99999993E-9 : f32
    %136 = vector.broadcast %cst_54 : f32 to vector<8x1xf32>
    %137 = arith.addf %135, %136 : vector<8x1xf32>
    %138 = tpu.reciprocal %137 {approx = true} : vector<8x1xf32> -> vector<8x1xf32>
    %139 = vector.broadcast %138 : vector<8x1xf32> to vector<8x32xf32>
    %140 = arith.mulf %129, %139 : vector<8x32xf32>
    %141 = vector.broadcast %4 : vector<1x32xf32> to vector<8x32xf32>
    %142 = arith.mulf %141, %140 : vector<8x32xf32>
    %143 = vector.broadcast %5 : vector<1x32xf32> to vector<8x32xf32>
    %144 = arith.addf %142, %143 : vector<8x32xf32>
    %145 = arith.truncf %144 : vector<8x32xf32> to vector<8x32xbf16>
    %c0_55 = arith.constant 0 : index
    %c0_56 = arith.constant 0 : index
    %146 = vector.load %arg6[%c0_55, %c0_56] : memref<32x128xbf16, #tpu.memory_space<vmem>>, vector<32x128xbf16>
    %cst_57 = arith.constant dense<0.000000e+00> : vector<8x128xf32>
    %147 = tpu.matmul %145, %146, %cst_57 {dimension_numbers = #tpu.dot_dimension_numbers<[1], [0], [0], [1], [0, 0, 1, 1], [], []>} : vector<8x32xbf16>, vector<32x128xbf16>, vector<8x128xf32> -> vector<8x128xf32>
    %cst_58 = arith.constant 0.000000e+00 : f32
    %148 = vector.broadcast %cst_58 : f32 to vector<8x128xf32>
    %149 = arith.maximumf %147, %148 : vector<8x128xf32>
    %150 = arith.truncf %149 : vector<8x128xf32> to vector<8x128xbf16>
    %c0_59 = arith.constant 0 : index
    %c0_60 = arith.constant 0 : index
    %151 = vector.load %arg7[%c0_59, %c0_60] : memref<128x32xbf16, #tpu.memory_space<vmem>>, vector<128x32xbf16>
    %cst_61 = arith.constant dense<0.000000e+00> : vector<8x32xf32>
    %152 = tpu.matmul %150, %151, %cst_61 {dimension_numbers = #tpu.dot_dimension_numbers<[1], [0], [0], [1], [0, 0, 1, 1], [], []>} : vector<8x128xbf16>, vector<128x32xbf16>, vector<8x32xf32> -> vector<8x32xf32>
    %153 = arith.addf %129, %152 : vector<8x32xf32>
    %c0_62 = arith.constant 0 : index
    %c0_63 = arith.constant 0 : index
    %c0_64 = arith.constant 0 : index
    %154 = vector.load %arg12[%c0_62, %c0_63, %c0_64] : memref<1x8x32xf32, #tpu.memory_space<vmem>>, vector<1x8x32xf32>
    %155 = vector.shape_cast %154 : vector<1x8x32xf32> to vector<8x32xf32>
    %156 = vector.shape_cast %153 : vector<8x32xf32> to vector<1x8x32xf32>
    tpu.vector_store %arg12[%c0_62, %c0_63, %c0_64], %156 {strides = array<i32>} : memref<1x8x32xf32, #tpu.memory_space<vmem>>, vector<1x8x32xf32>,
    return
  }
  func.func @transform_0(%arg0: i32, %arg1: i32) -> (i32, i32, i32) {
    %c0_i32 = arith.constant 0 : i32
    %c0_i32_0 = arith.constant 0 : i32
    %c0_i32_1 = arith.constant 0 : i32
    return %arg0, %c0_i32, %c0_i32_0 : i32, i32, i32
  }
  func.func @transform_1(%arg0: i32, %arg1: i32) -> (i32, i32) {
    %c0_i32 = arith.constant 0 : i32
    %c0_i32_0 = arith.constant 0 : i32
    %c0_i32_1 = arith.constant 0 : i32
    return %c0_i32, %c0_i32_0 : i32, i32
  }
  func.func @transform_2(%arg0: i32, %arg1: i32) -> (i32, i32) {
    %c0_i32 = arith.constant 0 : i32
    %c0_i32_0 = arith.constant 0 : i32
    %c0_i32_1 = arith.constant 0 : i32
    return %c0_i32, %c0_i32_0 : i32, i32
  }
  func.func @transform_3(%arg0: i32, %arg1: i32) -> (i32, i32, i32) {
    %c0_i32 = arith.constant 0 : i32
    %c0_i32_0 = arith.constant 0 : i32
    %c0_i32_1 = arith.constant 0 : i32
    %c0_i32_2 = arith.constant 0 : i32
    return %c0_i32, %c0_i32_0, %c0_i32_1 : i32, i32, i32
  }
  func.func @transform_4(%arg0: i32, %arg1: i32) -> (i32, i32) {
    %c0_i32 = arith.constant 0 : i32
    %c0_i32_0 = arith.constant 0 : i32
    %c0_i32_1 = arith.constant 0 : i32
    return %c0_i32, %c0_i32_0 : i32, i32
  }
  func.func @transform_5(%arg0: i32, %arg1: i32) -> (i32, i32) {
    %c0_i32 = arith.constant 0 : i32
    %c0_i32_0 = arith.constant 0 : i32
    %c0_i32_1 = arith.constant 0 : i32
    return %c0_i32, %c0_i32_0 : i32, i32
  }
  func.func @transform_6(%arg0: i32, %arg1: i32) -> (i32, i32) {
    %c0_i32 = arith.constant 0 : i32
    %c0_i32_0 = arith.constant 0 : i32
    %c0_i32_1 = arith.constant 0 : i32
    return %c0_i32, %c0_i32_0 : i32, i32
  }
  func.func @transform_7(%arg0: i32, %arg1: i32) -> (i32, i32) {
    %c0_i32 = arith.constant 0 : i32
    %c0_i32_0 = arith.constant 0 : i32
    %c0_i32_1 = arith.constant 0 : i32
    return %c0_i32, %c0_i32_0 : i32, i32
  }
  func.func @transform_8(%arg0: i32, %arg1: i32) -> (i32, i32) {
    %c0_i32 = arith.constant 0 : i32
    %c0_i32_0 = arith.constant 0 : i32
    %c0_i32_1 = arith.constant 0 : i32
    return %c0_i32, %c0_i32_0 : i32, i32
  }
  func.func @transform_9(%arg0: i32, %arg1: i32) -> (i32, i32) {
    %c0_i32 = arith.constant 0 : i32
    %c0_i32_0 = arith.constant 0 : i32
    %c0_i32_1 = arith.constant 0 : i32
    return %c0_i32, %c0_i32_0 : i32, i32
  }
  func.func @transform_10(%arg0: i32, %arg1: i32) -> (i32, i32, i32) {
    %c0_i32 = arith.constant 0 : i32
    %c0_i32_0 = arith.constant 0 : i32
    return %arg0, %arg1, %c0_i32 : i32, i32, i32
  }
}

</mosaic_0001>

<bundles_post_ra>
// kernel: tpu_custom_call.1
= control target key start
LH: loop header
LB: loop body
LE: loop exit
PB: predicated region body
PF: predicated region fallthrough
CT: control target
= control target key end

     0   :  { %s3154_s0 = inlined_call_operand.hbm [shape: f32[2,8,32], index: 0, kind: input, shape index: {}]   ;;  %s3155_s1 = inlined_call_operand.hbm [shape: bf16[32,32], index: 1, kind: input, shape index: {}]   ;;  %s3156_s2 = inlined_call_operand.hbm [shape: bf16[32,64], index: 2, kind: input, shape index: {}]   ;;  %s3157_s3 = inlined_call_operand.hbm [shape: bf16[4,8,32], index: 3, kind: input, shape index: {}]   ;;  %s3158_s4 = inlined_call_operand.hbm [shape: bf16[32,128], index: 4, kind: input, shape index: {}]   ;;  %s3159_s5 = inlined_call_operand.hbm [shape: bf16[128,32], index: 5, kind: input, shape index: {}]   ;;  %s3160_s6 = inlined_call_operand.hbm [shape: f32[1,32], index: 6, kind: input, shape index: {}]   ;;  %s3161_s7 = inlined_call_operand.hbm [shape: f32[1,32], index: 7, kind: input, shape index: {}]   ;;  %s3162_s8 = inlined_call_operand.hbm [shape: f32[1,32], index: 8, kind: input, shape index: {}]   ;;  %s3163_s9 = inlined_call_operand.hbm [shape: f32[1,32], index: 9, kind: input, shape index: {}]   ;;  %s3164_s10 = inlined_call_operand.hbm [shape: f32[2,8,32], index: 10, kind: output, shape index: {}]  }
   0x1   :  { %3173 = sst [smem:[#allocation29_spill]] %s3154_s0 }
   0x2   :  { %3174 = sst [smem:[#allocation30_spill]] %s3155_s1 }
   0x3   :  { %3175 = sst [smem:[#allocation31_spill]] %s3156_s2 }
   0x4   :  { %3176 = sst [smem:[#allocation32_spill]] %s3157_s3 }
   0x5   :  { %3177 = sst [smem:[#allocation33_spill]] %s3164_s10 }
   0x6   :  { %15 = vsyncpa [#allocation3], 0 }
   0x7   :  { %17 = vsyncpa [#allocation3 + $0x1], 0 }
   0x8   :  { %18 = vsyncpa [#allocation6], 0 }
   0x9   :  { %19 = vsyncpa [#allocation9], 0 }
   0xa   :  { %20 = vsyncpa [#allocation12], 0 }
   0xb   :  { %21 = vsyncpa [#allocation15], 0 }
   0xc   :  { %22 = vsyncpa [#allocation18], 0 }
   0xd   :  { %23 = vsyncpa [#allocation4], 0 }
   0xe   :  { %25 = vsyncpa [#allocation4 + $0x1], 0  ;;  %s2596_s13 = smov 0   ;;  %s2598_s14 = smov 0  }
   0xf   :  { %s2600_s15 = smov 0   ;;  %s2602_s16 = smov 0  }
  0x10   :  { %s2604_s17 = smov 0   ;;  %s2606_s18 = smov 0  }
  0x11 LB: > { %3178 = sst [smem:[#allocation27_spill]] %s2509_s16  ;;  %s3165_s19 = sadd.s32 4294967295, %s2517_s18   ;;  %s2517_s18 = sphi %s2606_s18, %s31_s18   ;;  %s2513_s17 = sphi %s2604_s17, %s3208_s17   ;;  %s2509_s16 = sphi %s2602_s16, %s3207_s16   ;;  %s2505_s15 = sphi %s2600_s15, %s3206_s15   ;;  %s2501_s14 = sphi %s2598_s14, %s3205_s14   ;;  %s2497_s13 = sphi %s2596_s13, %s3204_s13  }
  0x12   : > { %p1698_p0 = scmp.ge.s32.totalorder %s2517_s18, 1  ;;  %p2630_p1 = scmp.eq.s32.totalorder %s3165_s19, 0 }
  0x13   : > { %p291_p2 = scmp.lt.s32.totalorder %s2517_s18, 3  ;;  %s2519_s22 = smov [#allocation5]  }
  0x14   : > { %s3179_s20 = scalar_select %p2630_p1, 1, 0 }
  0x15   : > { %p2635_p3 = pnand %p1698_p0, %p291_p2  ;;  %s303_s23 = sshll.u32 %s2519_s22, 4  ;;  %s2639_s23 = int_to_ptr.vmem [resolvable:$true] %s303_s23 }
  0x16   : > { %s2520_s25 = smov [#allocation8]   ;;  %s2521_s27 = smov [#allocation11]  }
  0x17   : > { %s3180_s21 = scalar_select %p2635_p3, 1, 0 }
  0x18   : > { %p1971_p4 = pneg %p2635_p3  ;;  %s329_s26 = sshll.u32 %s2520_s25, 4  ;;  %s2650_s26 = int_to_ptr.vmem [resolvable:$true] %s329_s26 }
  0x19   : > { %3181 = sst [smem:[#allocation28_spill]] %s3180_s21  ;;  %s2652_s28 = sshll.u32 %s2521_s27, 4  ;;  %s356_s28 = int_to_ptr.vmem [resolvable:$true] %s2652_s28 }
  0x1a   : > { %p2646_p6 = pnand %p1971_p4, %p2630_p1  ;;  %s3183_s1 = sld [smem:[#allocation30_spill]] }
  0x1c   : > { %p2662_p8 = pneg %p2646_p6 }
  0x20   : > { %s2133_s11 = scalar_lea.hbm %s3183_s1, 256 }
  0x21   : > { %p2134_p7 = scmp.ne.s32.totalorder %s3183_s1, %s2133_s11  ;;  %p2140_p11 = scmp.lt.u32.totalorder %s2133_s11, %s3183_s1 }
  0x23   : > { %p2136_p9 = pnand %p2662_p8, %p2134_p7 }
  0x25   : > { %p2137_p10 = pneg %p2136_p9 }
  0x27   : > { %p2142_p12 = pnand %p2140_p11, %p2137_p10 }
  0x29   : > { %2145 = shalt.err (!%p2142_p12)
}
  0x2a   : > { %s2146_s29 = scalar_lea.vmem %s2639_s23, 256  ;;  %p2154_p4 = scmp.lt.s32.totalorder %s2639_s23, %s2639_s23 }
  0x2b   : > { %p2147_p13 = scmp.ne.s32.totalorder %s2639_s23, %s2146_s29  ;;  %p2155_p5 = scmp.lt.s32.totalorder %s2146_s29, %s2146_s29 }
  0x2d   : > { %p2149_p0 = pnand %p2147_p13, %p2662_p8  ;;  %p2156_p7 = por %p2155_p5, %p2154_p4 }
  0x2f   : > { %p2150_p2 = pneg %p2149_p0 }
  0x31   : > { %p2157_p9 = pnand %p2156_p7, %p2150_p2 }
  0x33   : > { %2160 = shalt.err (!%p2157_p9)
}
  0x34   : > { %s2522_s30 = smov 64   ;;  %s2523_s11 = smov 4  }
  0x35   : > { %1974 = dma.hbm_to_vmem [thread:$0]  (!%p2646_p6), %s3183_s1, 256, %s2639_s23, [#allocation6], %s2522_s30, %s2522_s30, %s2523_s11  }
  0x36   : > { %s3185_s3 = sld [smem:[#allocation32_spill]] }
  0x3c   : > { %s2161_s29 = scalar_lea.hbm %s3185_s3, 256 }
  0x3d   : > { %p2162_p5 = scmp.ne.s32.totalorder %s3185_s3, %s2161_s29  ;;  %p2168_p12 = scmp.lt.u32.totalorder %s2161_s29, %s3185_s3 }
  0x3f   : > { %p2164_p10 = pnand %p2162_p5, %p2662_p8 }
  0x41   : > { %p2165_p11 = pneg %p2164_p10 }
  0x43   : > { %p2170_p13 = pnand %p2168_p12, %p2165_p11 }
  0x45   : > { %2173 = shalt.err (!%p2170_p13)
}
  0x46   : > { %s2174_s23 = scalar_lea.vmem %s2650_s26, 256  ;;  %p2182_p7 = scmp.lt.s32.totalorder %s2650_s26, %s2650_s26 }
  0x47   : > { %p2175_p0 = scmp.ne.s32.totalorder %s2650_s26, %s2174_s23  ;;  %p2183_p9 = scmp.lt.s32.totalorder %s2174_s23, %s2174_s23 }
  0x49   : > { %p2177_p2 = pnand %p2175_p0, %p2662_p8  ;;  %p2184_p5 = por %p2183_p9, %p2182_p7 }
  0x4b   : > { %p2178_p4 = pneg %p2177_p2 }
  0x4d   : > { %p2185_p10 = pnand %p2184_p5, %p2178_p4 }
  0x4f   : > { %2188 = shalt.err (!%p2185_p10)
}
  0x50   : > { %1980 = dma.hbm_to_vmem [thread:$0]  (!%p2646_p6), %s3185_s3, 256, %s2650_s26, [#allocation9], %s2522_s30, %s2522_s30, %s2523_s11  }
  0x51   : > { %s2189_s12 = scalar_lea.hbm %s3159_s5, 1024 }
  0x52   : > { %p2190_p11 = scmp.ne.s32.totalorder %s3159_s5, %s2189_s12  ;;  %p2196_p0 = scmp.lt.u32.totalorder %s2189_s12, %s3159_s5 }
  0x54   : > { %p2192_p12 = pnand %p2190_p11, %p2662_p8 }
  0x56   : > { %p2193_p13 = pneg %p2192_p12 }
  0x58   : > { %p2198_p2 = pnand %p2196_p0, %p2193_p13 }
  0x5a   : > { %2201 = shalt.err (!%p2198_p2)
}
  0x5b   : > { %s2202_s23 = scalar_lea.vmem %s356_s28, 1024  ;;  %p2210_p5 = scmp.lt.s32.totalorder %s356_s28, %s356_s28 }
  0x5c   : > { %p2203_p4 = scmp.ne.s32.totalorder %s356_s28, %s2202_s23  ;;  %p2211_p10 = scmp.lt.s32.totalorder %s2202_s23, %s2202_s23 }
  0x5e   : > { %p2205_p7 = pnand %p2203_p4, %p2662_p8  ;;  %p2212_p3 = por %p2211_p10, %p2210_p5 }
  0x60   : > { %p2206_p9 = pneg %p2205_p7 }
  0x62   : > { %p2213_p1 = pnand %p2212_p3, %p2206_p9 }
  0x64   : > { %2216 = shalt.err (!%p2213_p1)
}
  0x65   : > { %1986 = dma.hbm_to_vmem [thread:$0]  (!%p2646_p6), %s3159_s5, 1024, %s356_s28, [#allocation12], %s2522_s30, %s2522_s30, %s2523_s11  }
  0x66   : > { %s2524_s10 = smov [#allocation14]   ;;  %s2525_s21 = smov [#allocation7]  }
  0x67   : > { %s380_s16 = sshll.u32 %s2524_s10, 4  ;;  %s316_s12 = sshll.u32 %s2525_s21, 4  ;;  %s381_s16 = int_to_ptr.vmem [resolvable:$true] %s380_s16  ;;  %s317_s12 = int_to_ptr.vmem [resolvable:$true] %s316_s12 }
  0x68   : > { %s2217_s27 = scalar_lea.hbm %s3161_s7, 16 }
  0x69   : > { %p2218_p1 = scmp.ne.s32.totalorder %s3161_s7, %s2217_s27  ;;  %p2224_p12 = scmp.lt.u32.totalorder %s2217_s27, %s3161_s7 }
  0x6b   : > { %p2220_p3 = pnand %p2218_p1, %p2662_p8 }
  0x6d   : > { %p2221_p11 = pneg %p2220_p3 }
  0x6f   : > { %p2226_p13 = pnand %p2224_p12, %p2221_p11 }
  0x71   : > { %2229 = shalt.err (!%p2226_p13)
}
  0x72   : > { %s2230_s28 = scalar_lea.vmem %s381_s16, 16  ;;  %s2237_s0 = scalar_lea.vmem %s381_s16, 32 }
  0x73   : > { %p2231_p0 = scmp.ne.s32.totalorder %s381_s16, %s2230_s28  ;;  %p2238_p7 = scmp.lt.s32.totalorder %s381_s16, %s381_s16 }
  0x74   : > { %p2239_p9 = scmp.lt.s32.totalorder %s2237_s0, %s2230_s28 }
  0x75   : > { %p2233_p2 = pnand %p2231_p0, %p2662_p8 }
  0x76   : > { %p2240_p5 = por %p2239_p9, %p2238_p7 }
  0x77   : > { %p2234_p4 = pneg %p2233_p2 }
  0x79   : > { %p2241_p10 = pnand %p2240_p5, %p2234_p4 }
  0x7b   : > { %2244 = shalt.err (!%p2241_p10)
}
  0x7c   : > { %1992 = dma.hbm_to_vmem [thread:$0]  (!%p2646_p6), %s3161_s7, 16, %s381_s16, [#allocation15]  }
  0x7d   : > { %s3186_s2 = sld [smem:[#allocation31_spill]] }
  0x83   : > { %s2245_s25 = scalar_lea.hbm %s3186_s2, 256 }
  0x84   : > { %p2246_p1 = scmp.ne.s32.totalorder %s3186_s2, %s2245_s25  ;;  %p2252_p12 = scmp.lt.u32.totalorder %s2245_s25, %s3186_s2 }
  0x86   : > { %p2248_p3 = pnand %p2246_p1, %p2662_p8 }
  0x88   : > { %p2249_p11 = pneg %p2248_p3 }
  0x8a   : > { %p2254_p13 = pnand %p2252_p12, %p2249_p11 }
  0x8c   : > { %2257 = shalt.err (!%p2254_p13)
}
  0x8d   : > { %s2258_s28 = scalar_lea.vmem %s317_s12, 256  ;;  %p2266_p7 = scmp.lt.s32.totalorder %s317_s12, %s317_s12 }
  0x8e   : > { %p2259_p0 = scmp.ne.s32.totalorder %s317_s12, %s2258_s28  ;;  %p2267_p9 = scmp.lt.s32.totalorder %s2258_s28, %s2258_s28 }
  0x90   : > { %p2261_p2 = pnand %p2259_p0, %p2662_p8  ;;  %p2268_p5 = por %p2267_p9, %p2266_p7 }
  0x92   : > { %p2262_p4 = pneg %p2261_p2 }
  0x94   : > { %p2269_p10 = pnand %p2268_p5, %p2262_p4 }
  0x96   : > { %2272 = shalt.err (!%p2269_p10)
}
  0x97   : > { %1977 = dma.hbm_to_vmem [thread:$0]  (!%p2646_p6), %s3186_s2, 256, %s317_s12, [#allocation6], %s2522_s30, %s2522_s30, %s2523_s11  }
  0x98   : > { %s2526_s10 = smov [#allocation10]   ;;  %s2527_s1 = smov [#allocation13]  }
  0x99   : > { %s342_s21 = sshll.u32 %s2526_s10, 4  ;;  %s369_s22 = sshll.u32 %s2527_s1, 4  ;;  %s343_s21 = int_to_ptr.vmem [resolvable:$true] %s342_s21  ;;  %s370_s22 = int_to_ptr.vmem [resolvable:$true] %s369_s22 }
  0x9a   : > { %s2273_s29 = scalar_lea.hbm %s3158_s4, 256 }
  0x9b   : > { %p2274_p1 = scmp.ne.s32.totalorder %s3158_s4, %s2273_s29  ;;  %p2280_p12 = scmp.lt.u32.totalorder %s2273_s29, %s3158_s4 }
  0x9d   : > { %p2276_p3 = pnand %p2274_p1, %p2662_p8 }
  0x9f   : > { %p2277_p11 = pneg %p2276_p3 }
  0xa1   : > { %p2282_p13 = pnand %p2280_p12, %p2277_p11 }
  0xa3   : > { %2285 = shalt.err (!%p2282_p13)
}
  0xa4   : > { %s2286_s12 = scalar_lea.vmem %s343_s21, 256  ;;  %p2294_p7 = scmp.lt.s32.totalorder %s343_s21, %s343_s21 }
  0xa5   : > { %p2287_p0 = scmp.ne.s32.totalorder %s343_s21, %s2286_s12  ;;  %p2295_p9 = scmp.lt.s32.totalorder %s2286_s12, %s2286_s12 }
  0xa7   : > { %p2289_p2 = pnand %p2287_p0, %p2662_p8  ;;  %p2296_p5 = por %p2295_p9, %p2294_p7 }
  0xa9   : > { %p2290_p4 = pneg %p2289_p2 }
  0xab   : > { %p2297_p10 = pnand %p2296_p5, %p2290_p4 }
  0xad   : > { %2300 = shalt.err (!%p2297_p10)
}
  0xae   : > { %1983 = dma.hbm_to_vmem [thread:$0]  (!%p2646_p6), %s3158_s4, 256, %s343_s21, [#allocation9], %s2522_s30, %s2522_s30, %s2523_s11  }
  0xaf   : > { %s2301_s27 = scalar_lea.hbm %s3160_s6, 16 }
  0xb0   : > { %p2302_p1 = scmp.ne.s32.totalorder %s3160_s6, %s2301_s27  ;;  %p2308_p12 = scmp.lt.u32.totalorder %s2301_s27, %s3160_s6 }
  0xb2   : > { %p2304_p3 = pnand %p2302_p1, %p2662_p8 }
  0xb4   : > { %p2305_p11 = pneg %p2304_p3 }
  0xb6   : > { %p2310_p13 = pnand %p2308_p12, %p2305_p11 }
  0xb8   : > { %2313 = shalt.err (!%p2310_p13)
}
  0xb9   : > { %s2314_s16 = scalar_lea.vmem %s370_s22, 16  ;;  %s2321_s30 = scalar_lea.vmem %s370_s22, 32 }
  0xba   : > { %p2315_p0 = scmp.ne.s32.totalorder %s370_s22, %s2314_s16  ;;  %p2322_p7 = scmp.lt.s32.totalorder %s370_s22, %s370_s22 }
  0xbb   : > { %p2323_p9 = scmp.lt.s32.totalorder %s2321_s30, %s2314_s16 }
  0xbc   : > { %p2317_p2 = pnand %p2315_p0, %p2662_p8 }
  0xbd   : > { %p2324_p5 = por %p2323_p9, %p2322_p7 }
  0xbe   : > { %p2318_p4 = pneg %p2317_p2 }
  0xc0   : > { %p2325_p10 = pnand %p2324_p5, %p2318_p4 }
  0xc2   : > { %2328 = shalt.err (!%p2325_p10)
}
  0xc3   : > { %1989 = dma.hbm_to_vmem [thread:$0]  (!%p2646_p6), %s3160_s6, 16, %s370_s22, [#allocation12]  }
  0xc4   : > { %s2528_s12 = smov [#allocation16]   ;;  %s2529_s10 = smov [#allocation17]  }
  0xc5   : > { %s391_s0 = sshll.u32 %s2528_s12, 4  ;;  %s402_s1 = sshll.u32 %s2529_s10, 4  ;;  %s392_s0 = int_to_ptr.vmem [resolvable:$true] %s391_s0  ;;  %s403_s1 = int_to_ptr.vmem [resolvable:$true] %s402_s1 }
  0xc6   : > { %s2329_s29 = scalar_lea.hbm %s3162_s8, 16 }
  0xc7   : > { %p2330_p1 = scmp.ne.s32.totalorder %s3162_s8, %s2329_s29  ;;  %p2336_p12 = scmp.lt.u32.totalorder %s2329_s29, %s3162_s8 }
  0xc9   : > { %p2332_p3 = pnand %p2330_p1, %p2662_p8 }
  0xcb   : > { %p2333_p11 = pneg %p2332_p3 }
  0xcd   : > { %p2338_p13 = pnand %p2336_p12, %p2333_p11 }
  0xcf   : > { %2341 = shalt.err (!%p2338_p13)
}
  0xd0   : > { %s2342_s22 = scalar_lea.vmem %s392_s0, 16  ;;  %s2349_s30 = scalar_lea.vmem %s392_s0, 32 }
  0xd1   : > { %p2343_p0 = scmp.ne.s32.totalorder %s392_s0, %s2342_s22  ;;  %p2350_p7 = scmp.lt.s32.totalorder %s392_s0, %s392_s0 }
  0xd2   : > { %p2351_p9 = scmp.lt.s32.totalorder %s2349_s30, %s2342_s22 }
  0xd3   : > { %p2345_p2 = pnand %p2343_p0, %p2662_p8 }
  0xd4   : > { %p2352_p5 = por %p2351_p9, %p2350_p7 }
  0xd5   : > { %p2346_p4 = pneg %p2345_p2 }
  0xd7   : > { %p2353_p10 = pnand %p2352_p5, %p2346_p4 }
  0xd9   : > { %2356 = shalt.err (!%p2353_p10)
}
  0xda   : > { %1995 = dma.hbm_to_vmem [thread:$0]  (!%p2646_p6), %s3162_s8, 16, %s392_s0, [#allocation15]  }
  0xdb   : > { %s2357_s25 = scalar_lea.hbm %s3163_s9, 16 }
  0xdc   : > { %p2358_p1 = scmp.ne.s32.totalorder %s3163_s9, %s2357_s25  ;;  %p2364_p12 = scmp.lt.u32.totalorder %s2357_s25, %s3163_s9 }
  0xde   : > { %p2360_p3 = pnand %p2358_p1, %p2662_p8 }
  0xe0   : > { %p2361_p11 = pneg %p2360_p3 }
  0xe2   : > { %p2366_p13 = pnand %p2364_p12, %p2361_p11 }
  0xe4   : > { %2369 = shalt.err (!%p2366_p13)
}
  0xe5   : > { %s2370_s28 = scalar_lea.vmem %s403_s1, 16  ;;  %s2377_s0 = scalar_lea.vmem %s403_s1, 32 }
  0xe6   : > { %p2371_p0 = scmp.ne.s32.totalorder %s403_s1, %s2370_s28  ;;  %p2378_p7 = scmp.lt.s32.totalorder %s403_s1, %s403_s1 }
  0xe7   : > { %p2379_p9 = scmp.lt.s32.totalorder %s2377_s0, %s2370_s28 }
  0xe8   : > { %p2373_p2 = pnand %p2371_p0, %p2662_p8 }
  0xe9   : > { %p2380_p5 = por %p2379_p9, %p2378_p7 }
  0xea   : > { %p2374_p4 = pneg %p2373_p2 }
  0xec   : > { %p2381_p10 = pnand %p2380_p5, %p2374_p4 }
  0xee   : > { %2384 = shalt.err (!%p2381_p10)
}
  0xef   : > { %1998 = dma.hbm_to_vmem [thread:$0]  (!%p2646_p6), %s3163_s9, 16, %s403_s1, [#allocation18]  }
  0xf0   : > { %s1697_s19 = sadd.s32 4294967294, %s2517_s18   ;;  %s43_s30 = sadd.s32 1, %s2513_s17 }
  0xf1   : > { %s50_s24 = sadd.s32 1, %s2505_s15  ;;  %p45_p8 = scmp.ge.s32.totalorder %s43_s30, 2 }
  0xf2   : > { %p57_p1 = scmp.ne.s32.totalorder %s2505_s15, %s2501_s14  ;;  %p58_p3 = scmp.eq.s32.totalorder %s2517_s18, 0 }
  0xf3   : > { %p63_p11 = scmp.ne.s32.totalorder %s2501_s14, %s2497_s13  ;;  %s3210_s30 = smov (%p45_p8, %s43_s30), 0 }
  0xf4   : > { %p2858_p12 = por %p58_p3, %p57_p1  ;;  %p3188_p13 = scmp.ne.s32.totalorder %s3179_s20, 0 }
  0xf5   : > { %s47_s21 = ssub.s32 %s2513_s17, %s3210_s30  ;;  %s3190_s12 = sadd.s32 4294967295, %s2517_s18  }
  0xf6   : > { %p2864_p6 = por %p3188_p13, %p63_p11  ;;  %p278_p0 = scmp.eq.s32.totalorder %s3190_s12, 1 }
  0xf7   : > { %p48_p2 = scmp.eq.s32.totalorder %s47_s21, 0  ;;  %p284_p4 = scmp.eq.s32.totalorder %s1697_s19, 1 }
  0xf8   : > { %p2872_p7 = por %p278_p0, %p57_p1  ;;  %p2016_p9 = scmp.lt.s32.totalorder %s2517_s18, 2 }
  0xf9   : > { %s2878_s25 = scalar_select %p48_p2, %s2505_s15, %s50_s24  }
  0xfa   : > { %s3191_s10 = scalar_select %p2872_p7, 1, 0 }
  0xfb   : > { %p2880_p5 = por %p284_p4, %p63_p11  ;;  %s413_s29 = sand.u32 1, %s2505_s15  }
  0xfc   : > { %s1709_s23 = sshll.u32 %s413_s29, 3  ;;  %s1710_s26 = sshll.u32 %s2513_s17, 7 }
  0xfd   : > { %s3192_s27 = scalar_select %p2880_p5, 1, 0 }
  0xfe   : > { %s3193_s16 = sld [smem:[#allocation29_spill]]  ;;  %s417_s19 = scalar_lea.vmem [#allocation2], %s1709_s23 }
  0xff   : > { %s424_s21 = sshll.u32 %s417_s19, 4  ;;  %p2895_p10 = pnand %p2016_p9, %p2858_p12  ;;  %s2891_s21 = int_to_ptr.vmem [resolvable:$true] %s424_s21 }
 0x100   : > { %s414_s2 = scalar_lea.sflag [#allocation3], %s413_s29 }
 0x101   : > { %p2387_p1 = pneg %p2895_p10 }
 0x104   : > { %s3194_s22 = smov %s3193_s16  ;;  %s2889_s12 = scalar_lea.hbm %s3193_s16, %s1710_s26 }
 0x105   : > { %s2385_s3 = scalar_lea.hbm %s2889_s12, 128  ;;  %s2390_s28 = scalar_lea.hbm %s3194_s22, 256 }
 0x106   : > { %p2386_p8 = scmp.ne.s32.totalorder %s2889_s12, %s2385_s3  ;;  %p2391_p12 = scmp.lt.u32.totalorder %s2889_s12, %s3194_s22 }
 0x107   : > { %p2392_p13 = scmp.lt.u32.totalorder %s2390_s28, %s2385_s3  ;;  %p2394_p2 = scmp.lt.u32.totalorder %s2385_s3, %s2889_s12 }
 0x108   : > { %p2388_p3 = pnand %p2387_p1, %p2386_p8 }
 0x109   : > { %p2393_p0 = por %p2392_p13, %p2391_p12 }
 0x10a   : > { %p2389_p11 = pneg %p2388_p3 }
 0x10b   : > { %p2395_p4 = por %p2394_p2, %p2393_p0 }
 0x10d   : > { %p2396_p9 = pnand %p2395_p4, %p2389_p11 }
 0x10f   : > { %2399 = shalt.err (!%p2396_p9)
}
 0x110   : > { %s2400_s29 = scalar_lea.vmem %s2891_s21, 128  ;;  %s2530_s16 = smov [#allocation2]  }
 0x111   : > { %p2401_p8 = scmp.ne.s32.totalorder %s2891_s21, %s2400_s29  ;;  %s2405_s19 = sshll.u32 %s2530_s16, 4  ;;  %s2406_s19 = int_to_ptr.vmem [resolvable:$false] %s2405_s19 }
 0x112   : > { %s2407_s23 = scalar_lea.vmem %s2406_s19, 256  ;;  %p2408_p7 = scmp.lt.s32.totalorder %s2891_s21, %s2406_s19 }
 0x113   : > { %p2403_p3 = pnand %p2401_p8, %p2387_p1  ;;  %p2409_p12 = scmp.lt.s32.totalorder %s2407_s23, %s2400_s29 }
 0x115   : > { %p2404_p5 = pneg %p2403_p3  ;;  %p2410_p13 = por %p2409_p12, %p2408_p7 }
 0x117   : > { %p2411_p0 = pnand %p2410_p13, %p2404_p5 }
 0x119   : > { %2414 = shalt.err (!%p2411_p0)
}
 0x11a   : > { %2002 = dma.hbm_to_vmem [thread:$0]  (!%p2895_p10), %s2889_s12, 128, %s2891_s21, %s414_s2  }
 0x11b   : > { %s3196_s3 = sld [smem:[#allocation28_spill]] }
 0x121   : > { %p3197_p11 = scmp.ne.s32.totalorder %s3196_s3, 0 }
 0x122   : > { %s2927_s26 = sand.u32 (!%p3197_p11), 1, %s2501_s14  }
 0x123   : > { %433 = sbr.rel (%p3197_p11) target bundleno = 3390 (0xd3e), region = 60  ;;  %s1712_s28 = sshll.u32 (!%p3197_p11), %s2927_s26, 3 }
 0x124   : > { %s436_s11 = scalar_lea.sflag (!%p3197_p11), [#allocation3], %s2927_s26  ;;  %s439_s0 = scalar_lea.vmem (!%p3197_p11), [#allocation2], %s1712_s28 }
 0x12a   : > { %2468 = dma.done.wait (%p2864_p6), %s436_s11, 128  }
 0x12b   : > { %2470 = vsyncadd (%p2864_p6), %s436_s11, 4294967168  ;;  %p3198_p7 = scmp.ne.s32.totalorder %s3179_s20, 0 }
 0x12d   : > { %2472 = dma.done.wait (%p3198_p7), [#allocation6], 512  }
 0x12e   : > { %2474 = vsyncadd (%p3198_p7), [#allocation6], 4294966784 }
 0x12f   : > { %2476 = dma.done.wait (%p3198_p7), [#allocation9], 512  }
 0x130   : > { %2478 = vsyncadd (%p3198_p7), [#allocation9], 4294966784 }
 0x131   : > { %2480 = dma.done.wait (%p3198_p7), [#allocation12], 1040  }
 0x132   : > { %2482 = vsyncadd (%p3198_p7), [#allocation12], 4294966256 }
 0x133   : > { %2484 = dma.done.wait (%p3198_p7), [#allocation15], 32  }
 0x134   : > { %2486 = vsyncadd (%p3198_p7), [#allocation15], 4294967264 }
 0x135   : > { %2488 = dma.done.wait (%p3198_p7), [#allocation18], 16  }
 0x136   : > { %2490 = vsyncadd (%p3198_p7), [#allocation18], 4294967280  ;;  %v2957_v0 = vld [vmem:[%s439_s0] sm:$0xff]  ;;  %vm520_vm0 = vcmask 261120   ;;  %v2095_v3 = vld [vmem:[#allocation5] sm:$0xff]   ;;  %v2531_v4 = vmov 0.0   ;;  %v669_v37 = vlaneseq }
 0x137   : > { %v519_v1 = vmul.f32 %v2957_v0, %v2957_v0  ;;  %1802 = vmatprep.subr.bf16.mxu0 %v2531_v4  ;;  %vm2532_vm1 = vmmov 0   ;;  %v2096_v5 = vld [vmem:[#allocation5 + $0x8] sm:$0xff]   ;;  %1824 = vmatprep.subr.bf16.mxu1 %v2531_v4  ;;  %v1723_v15 = vld [vmem:[#allocation13] ss:$0 sm:$0xff]  ;;  %v1724_v17 = vld [vmem:[#allocation14] ss:$0 sm:$0xff] }
 0x138   : > { %1806 = vmatprep.mubr.msk.bf16.mxu0 %vm2532_vm1, %v2531_v4  ;;  %1803 = vmatpush3.bf16.msra.mxu0 %v2095_v3  ;;  %v2097_v20 = vld [vmem:[#allocation7] sm:$0xff]   ;;  %v2098_v22 = vld [vmem:[#allocation7 + $0x8] sm:$0xff]   ;;  %vm676_vm4 = vcmask 64512   ;;  %s2533_s2 = smov 96   ;;  %vm742_vm5 = vcmask 1043456   ;;  %v2993_v38 = vshrl.u32 %v669_v37, 7 }
 0x139   : > { %v521_v2 = vsel %vm520_vm0, %v519_v1, 0.0  ;;  %1804 = vmatprep.subr.bf16.mxu0 %v2531_v4  ;;  %1826 = vmatprep.mubr.msk.bf16.mxu1 %vm2532_vm1, %v2531_v4  ;;  %v2995_v39 = vand.u32 127, %v669_v37  ;;  %s2534_s20 = smov 120   ;;  %s2535_s1 = smov 112   ;;  %v787_v61 = vld [vmem:[#allocation8] sm:$0xf] }
 0x13a   : > { %522 = vadd.xlane.f32.xlu0 %v521_v2  ;;  %v792_v62 = vsel %vm742_vm5, %v787_v61, 0  ;;  %s2536_s12 = smov 80   ;;  %s2537_s21 = smov 104  }
 0x13b   : > { %vm675_vm6 = vcmp.le.s32.totalorder %v2995_v39, %v2993_v38  ;;  %s2538_s24 = smov 88   ;;  %s2539_s29 = smov 72   ;;  %v1110_v39 = vld [vmem:[#allocation8 + $0x8] sm:$0xf] }
 0x13c   : > { %1805 = vmatpush3.bf16.msra.mxu0 %v2096_v5  ;;  %s3199_s16 = sld [smem:[#allocation27_spill]]  ;;  %s511_s23 = scalar_lea.vmem [#allocation19], %s1712_s28 }
 0x13d   : > { %1810 = vmatprep.subr.bf16.mxu0 %v2531_v4  ;;  %s1531_s3 = sshll.u32 %s511_s23, 4  ;;  %s1517_s28 = scalar_lea.sflag [#allocation4], %s2927_s26  ;;  %s3106_s3 = int_to_ptr.vmem [resolvable:$true] %s1531_s3 }
 0x13e   : > { %p3201_p5 = scmp.ne.s32.totalorder %s3191_s10, 0 }
 0x142   : > { %s1757_s19 = sshll.u32 %s3199_s16, 7 }
 0x1c7   : > { %v523_v6 = vpop.xlane.xlu0 %522 }
 0x1c8   : > { %v525_v7 = vmul.f32 0.03125, %v523_v6 }
 0x1ca   : > { %2109 = vrsqrt.f32 %v525_v7  ;;  %vm528_vm2 = vcmp.eq.f32.partialorder %v525_v7, inf  ;;  %v531_v10 = vand.u32 2147483648, %v525_v7  ;;  %vm530_vm3 = vcmp.eq.f32.partialorder %v525_v7, 0.0 }
 0x1d4   : > { %v2110_v8 = vpop.eup %2109 }
 0x1d5   : > { %v527_v9 = vmul.f32 %v2110_v8, %v525_v7 }
 0x1d7   : > { %v529_v11 = vsel %vm528_vm2, %v525_v7, %v527_v9 }
 0x1d8   : > { %v532_v12 = vsel %vm530_vm3, %v531_v10, %v529_v11 }
 0x1d9   : > { %v533_v13 = vadd.f32 1e-08, %v532_v12 }
 0x1db   : > { %2111 = vrcp.f32 %v533_v13 }
 0x1e5   : > { %v2112_v14 = vpop.eup %2111 }
 0x1e6   : > { %v535_v16 = vmul.f32 %v2112_v14, %v2957_v0 }
 0x1e8   : > { %v542_v18 = vmul.f32 %v1723_v15, %v535_v16 }
 0x1ea   : > { %v549_v19 = vadd.f32 %v1724_v17, %v542_v18 }
 0x1ec   : > { %v550_v21 = vpack.c.bf16 %v549_v19, %v549_v19 }
 0x1ee   : > { %1807 = vmatmul.mubr.msk.bf16.vlgmr.msra.gmra.mrb[0].mxu0 %vm520_vm0, %v550_v21 }
 0x1ef   : > { %1811 = vmatpush3.bf16.msra.mxu0 %v2097_v20  ;;  %1814 = vmatprep.mubr.msk.bf16.mxu0 %vm2532_vm1, %v2531_v4 }
 0x1f0   : > { %1812 = vmatprep.subr.bf16.mxu0 %v2531_v4 }
 0x1f3   : > { %1813 = vmatpush3.bf16.msra.mxu0 %v2098_v22 }
 0x1f4   : > { %1818 = vmatprep.subr.bf16.mxu0 %v2531_v4 }
 0x1f6   : > { %1815 = vmatmul.mubr.msk.bf16.vlgmr.msra.gmra.mrb[4].mxu0 %vm520_vm0, %v550_v21 }
 0x1f7   : > { %1820 = vmatprep.mubr.msk.bf16.mxu0 %vm2532_vm1, %v2531_v4 }
 0x2c1   : > { %v604_v23 = vpop.f32.mrb[0].mxu0 }
 0x2c2   : > { %v1808_v24 = vpop.f32.mrb[1].mxu0  ;;  %v666_v33 = vmul.f32 0.17677669, %v604_v23 }
 0x2c3   : > { %v607_v25 = vpop.f32.mrb[2].mxu0 }
 0x2c4   : > { %v1809_v26 = vpop.f32.mrb[3].mxu0  ;;  %v2985_v34 = vpack.c.bf16 %v666_v33, %v666_v33 }
 0x2c9   : > { %v660_v27 = vpop.f32.mrb[4].mxu0 }
 0x2ca   : > { %v2979_v28 = vpack.c.bf16 %v660_v27, %v660_v27  ;;  %v1816_v29 = vpop.f32.mrb[5].mxu0 }
 0x2cb   : > { %v663_v30 = vpop.f32.mrb[6].mxu0 }
 0x2cc   : > { %737 = vrot.lane.b32.xlu1 %v2979_v28, %s2533_s2  ;;  %v1817_v31 = vpop.f32.mrb[7].mxu0  ;;  %v681_v32 = vsel %vm676_vm4, %v2979_v28, 0  ;;  %s3200_s2 = sld [smem:[#allocation33_spill]] }
 0x2cd   : > { %1819 = vmatpush3.bf16.xpose.msra.mxu0 %v681_v32 }
 0x2ce   : > { %1830 = vmatprep.subr.bf16.mxu0 %v2531_v4 }
 0x2d4   : > { %1821 = vmatmul.mubr.msk.bf16.vlgmr.msra.gmra.mrb[8].mxu0 %vm676_vm4, %v2985_v34 }
 0x2d5   : > { %1832 = vmatprep.mubr.msk.bf16.mxu0 %vm2532_vm1, %v2531_v4  ;;  %1831 = vmatpush3.bf16.msra.mxu0 %v792_v62 }
 0x2d6   : > { %1842 = vmatprep.subr.bf16.mxu0 %v2531_v4 }
 0x33e   : > { %v738_v35 = vpop.permute.xlu1 %737 }
 0x33f   : > { %v744_v36 = vsel %vm742_vm5, %v738_v35, 0 }
 0x340   : > { %1825 = vmatpush3.bf16.msra.mxu1 %v744_v36 }
 0x341   : > { %1836 = vmatprep.subr.bf16.mxu1 %v2531_v4 }
 0x3a7   : > { %v717_v40 = vpop.f32.mrb[8].mxu0 }
 0x3a8   : > { %v723_v41 = vsel %vm675_vm6, %v717_v40, -3.4028235e+38  ;;  %v1822_v42 = vpop.f32.mrb[9].mxu0 }
 0x3a9   : > { %v720_v43 = vpop.f32.mrb[10].mxu0  ;;  %v724_v44 = vsel %vm676_vm4, %v723_v41, -inf }
 0x3aa   : > { %725 = vmax.xlane.f32.xlu0 %v724_v44  ;;  %v1823_v45 = vpop.f32.mrb[11].mxu0 }
 0x3c0   : > { %838 = vrot.lane.b32.xlu0 %v2979_v28, %s2534_s20 }
 0x437   : > { %v726_v46 = vpop.xlane.xlu0 %725 }
 0x438   : > { %v727_v47 = vsub.f32 %v723_v41, %v726_v46 }
 0x43a   : > { %v728_v48 = vmul.f32 1.442695, %v727_v47 }
 0x43b   : > { %v839_v54 = vpop.permute.xlu0 %838 }
 0x43c   : > { %2113 = vpow2.f32 %v728_v48  ;;  %v844_v57 = vsel %vm676_vm4, %v839_v54, 0 }
 0x446   : > { %v2114_v49 = vpop.eup %2113 }
 0x447   : > { %v730_v50 = vsel %vm676_vm4, %v2114_v49, 0.0 }
 0x448   : > { %731 = vadd.xlane.f32.xlu1 %v730_v50 }
 0x459   : > { %836 = vrot.lane.b32.xlu1 %v2985_v34, %s2534_s20  ;;  %s3104_s20 = scalar_lea.hbm %s3200_s2, %s1757_s19 }
 0x45d   : > { %999 = vrot.lane.b32.xlu1 %v2979_v28, %s2535_s1 }
 0x461   : > { %997 = vrot.lane.b32.xlu1 %v2985_v34, %s2535_s1  ;;  %s2415_s1 = scalar_lea.vmem %s3106_s3, 128 }
 0x462   : > { %p2416_p6 = scmp.ne.s32.totalorder %s3106_s3, %s2415_s1 }
 0x464   : > { %p2417_p10 = pnand %p2416_p6, %p3201_p5 }
 0x466   : > { %p2418_p1 = pneg %p2417_p10 }
 0x4d5   : > { %v732_v51 = vpop.xlane.xlu1 %731 }
 0x4d6   : > { %2115 = vrcp.f32 %v732_v51 }
 0x4d9   : > { %v837_v56 = vpop.permute.xlu1 %836 }
 0x4dd   : > { %v1000_v58 = vpop.permute.xlu1 %999 }
 0x4de   : > { %v1005_v59 = vsel %vm676_vm4, %v1000_v58, 0 }
 0x4e0   : > { %v2116_v52 = vpop.eup %2115 }
 0x4e1   : > { %v734_v53 = vmul.f32 %v2116_v52, %v2114_v49  ;;  %v998_v60 = vpop.permute.xlu1 %997 }
 0x4e3   : > { %v735_v55 = vpack.c.bf16 %v734_v53, %v734_v53 }
 0x4e5   : > { %1827 = vmatmul.mubr.msk.bf16.vlgmr.msra.gmra.mrb[0].mxu1 %vm676_vm4, %v735_v55 }
 0x4e6   : > { %1837 = vmatpush3.bf16.xpose.msra.mxu1 %v844_v57  ;;  %1838 = vmatprep.mubr.msk.bf16.mxu1 %vm2532_vm1, %v2531_v4 }
 0x4e7   : > { %1854 = vmatprep.subr.bf16.mxu1 %v2531_v4 }
 0x4ed   : > { %1839 = vmatmul.mubr.msk.bf16.vlgmr.msra.gmra.mrb[4].mxu1 %vm676_vm4, %v837_v56  ;;  %v949_v56 = vld [vmem:[#allocation8 + $0x4] sm:$0xf] }
 0x4ee   : > { %1855 = vmatpush3.bf16.xpose.msra.mxu1 %v1005_v59  ;;  %1856 = vmatprep.mubr.msk.bf16.mxu1 %vm2532_vm1, %v2531_v4  ;;  %v954_v57 = vsel %vm742_vm5, %v949_v56, 0 }
 0x4ef   : > { %1860 = vmatprep.subr.bf16.mxu1 %v2531_v4 }
 0x4f5   : > { %1857 = vmatmul.mubr.msk.bf16.vlgmr.msra.gmra.mrb[8].mxu1 %vm676_vm4, %v998_v60 }
 0x4f6   : > { %1862 = vmatprep.mubr.msk.bf16.mxu1 %vm2532_vm1, %v2531_v4 }
 0x5b8   : > { %v780_v63 = vpop.f32.mrb[0].mxu1 }
 0x5b9   : > { %v786_v1 = vpack.c.bf16 %v780_v63, %v780_v63  ;;  %v1828_v2 = vpop.f32.mrb[1].mxu1 }
 0x5ba   : > { %v783_v3 = vpop.f32.mrb[2].mxu1  ;;  %v1115_v2 = vsel %vm742_vm5, %v1110_v39, 0 }
 0x5bb   : > { %v1829_v5 = vpop.f32.mrb[3].mxu1  ;;  %1833 = vmatmul.mubr.msk.bf16.vlgmr.msra.gmra.mrb[12].mxu0 %vm676_vm4, %v786_v1 }
 0x5bc   : > { %1844 = vmatprep.mubr.msk.bf16.mxu0 %vm2532_vm1, %v2531_v4 }
 0x5c0   : > { %v880_v6 = vpop.f32.mrb[4].mxu1 }
 0x5c1   : > { %v1840_v7 = vpop.f32.mrb[5].mxu1  ;;  %v886_v23 = vsel %vm675_vm6, %v880_v6, -3.4028235e+38 }
 0x5c2   : > { %v883_v8 = vpop.f32.mrb[6].mxu1  ;;  %v887_v24 = vsel %vm676_vm4, %v886_v23, -inf }
 0x5c3   : > { %v1841_v9 = vpop.f32.mrb[7].mxu1 }
 0x5c8   : > { %v1041_v10 = vpop.f32.mrb[8].mxu1 }
 0x5c9   : > { %v1047_v11 = vsel %vm675_vm6, %v1041_v10, -3.4028235e+38  ;;  %v1858_v12 = vpop.f32.mrb[9].mxu1  ;;  %v1271_v10 = vld [vmem:[#allocation8 + $0xc] sm:$0xf] }
 0x5ca   : > { %v1044_v13 = vpop.f32.mrb[10].mxu1  ;;  %v1048_v14 = vsel %vm676_vm4, %v1047_v11, -inf }
 0x5cb   : > { %1049 = vmax.xlane.f32.xlu0 %v1048_v14  ;;  %v1859_v15 = vpop.f32.mrb[11].mxu1  ;;  %v1276_v13 = vsel %vm742_vm5, %v1271_v10, 0 }
 0x5e1   : > { %1060 = vrot.lane.b32.xlu0 %v2979_v28, %s2536_s12  ;;  %s2540_s12 = smov [#allocation19]  }
 0x5e5   : > { %1158 = vrot.lane.b32.xlu0 %v2985_v34, %s2537_s21 }
 0x658   : > { %v1050_v16 = vpop.xlane.xlu0 %1049 }
 0x659   : > { %v1051_v17 = vsub.f32 %v1047_v11, %v1050_v16 }
 0x65b   : > { %v1052_v18 = vmul.f32 1.442695, %v1051_v17 }
 0x65c   : > { %v1061_v19 = vpop.permute.xlu0 %1060 }
 0x65d   : > { %2117 = vpow2.f32 %v1052_v18  ;;  %v1066_v20 = vsel %vm742_vm5, %v1061_v19, 0 }
 0x65e   : > { %1861 = vmatpush3.bf16.msra.mxu1 %v1066_v20 }
 0x65f   : > { %1872 = vmatprep.subr.bf16.mxu1 %v2531_v4 }
 0x660   : > { %v1159_v32 = vpop.permute.xlu0 %1158 }
 0x667   : > { %v2118_v21 = vpop.eup %2117 }
 0x668   : > { %v1054_v22 = vsel %vm676_vm4, %v2118_v21, 0.0 }
 0x669   : > { %1055 = vadd.xlane.f32.xlu1 %v1054_v22 }
 0x67a   : > { %1160 = vrot.lane.b32.xlu1 %v2979_v28, %s2537_s21  ;;  %s2419_s21 = sshll.u32 %s2540_s12, 4  ;;  %s2420_s21 = int_to_ptr.vmem [resolvable:$false] %s2419_s21 }
 0x67b   : > { %p2422_p2 = scmp.lt.s32.totalorder %s3106_s3, %s2420_s21 }
 0x69e   : > { %888 = vmax.xlane.f32.xlu1 %v887_v24 }
 0x6f6   : > { %v1056_v25 = vpop.xlane.xlu1 %1055 }
 0x6f7   : > { %2119 = vrcp.f32 %v1056_v25 }
 0x6fa   : > { %v1161_v29 = vpop.permute.xlu1 %1160 }
 0x6fb   : > { %v1166_v31 = vsel %vm676_vm4, %v1161_v29, 0 }
 0x701   : > { %v2120_v26 = vpop.eup %2119 }
 0x702   : > { %v1058_v27 = vmul.f32 %v2120_v26, %v2118_v21  ;;  %v2099_v26 = vld [vmem:[#allocation10] sm:$0xff]  }
 0x704   : > { %v1059_v30 = vpack.c.bf16 %v1058_v27, %v1058_v27  ;;  %v2100_v27 = vld [vmem:[#allocation10 + $0x8] sm:$0xff]  }
 0x706   : > { %1863 = vmatmul.mubr.msk.bf16.vlgmr.msra.gmra.mrb[12].mxu1 %vm676_vm4, %v1059_v30 }
 0x707   : > { %1873 = vmatpush3.bf16.xpose.msra.mxu1 %v1166_v31  ;;  %1874 = vmatprep.mubr.msk.bf16.mxu1 %vm2532_vm1, %v2531_v4 }
 0x708   : > { %1890 = vmatprep.subr.bf16.mxu1 %v2531_v4 }
 0x70e   : > { %1875 = vmatmul.mubr.msk.bf16.vlgmr.msra.gmra.mrb[16].mxu1 %vm676_vm4, %v1159_v32 }
 0x70f   : > { %1894 = vmatprep.mubr.msk.bf16.mxu1 %vm2532_vm1, %v2531_v4  ;;  %1891 = vmatpush3.bf16.msra.mxu1 %v2099_v26 }
 0x710   : > { %1892 = vmatprep.subr.bf16.mxu1 %v2531_v4 }
 0x713   : > { %1893 = vmatpush3.bf16.msra.mxu1 %v2100_v27 }
 0x714   : > { %1898 = vmatprep.subr.bf16.mxu1 %v2531_v4 }
 0x72b   : > { %v889_v33 = vpop.xlane.xlu1 %888 }
 0x72c   : > { %v890_v34 = vsub.f32 %v886_v23, %v889_v33 }
 0x72e   : > { %v891_v35 = vmul.f32 1.442695, %v890_v34 }
 0x730   : > { %2121 = vpow2.f32 %v891_v35 }
 0x73a   : > { %v2122_v36 = vpop.eup %2121 }
 0x73b   : > { %v893_v37 = vsel %vm676_vm4, %v2122_v36, 0.0 }
 0x73c   : > { %894 = vadd.xlane.f32.xlu0 %v893_v37  ;;  %v1743_v37 = vld [vmem:[#allocation16] ss:$0 sm:$0xff] }
 0x752   : > { %899 = vrot.lane.b32.xlu0 %v2979_v28, %s2538_s24  ;;  %s2421_s24 = scalar_lea.vmem %s2420_s21, 256 }
 0x753   : > { %p2423_p4 = scmp.lt.s32.totalorder %s2421_s24, %s2415_s1 }
 0x755   : > { %p2424_p9 = por %p2423_p4, %p2422_p2 }
 0x757   : > { %p2425_p8 = pnand %p2424_p9, %p2418_p1 }
 0x7c9   : > { %v895_v40 = vpop.xlane.xlu0 %894 }
 0x7ca   : > { %2123 = vrcp.f32 %v895_v40 }
 0x7cd   : > { %v900_v41 = vpop.permute.xlu0 %899 }
 0x7ce   : > { %v905_v42 = vsel %vm742_vm5, %v900_v41, 0  ;;  %v1744_v41 = vld [vmem:[#allocation17] ss:$0 sm:$0xff] }
 0x7cf   : > { %1843 = vmatpush3.bf16.msra.mxu0 %v905_v42 }
 0x7d0   : > { %1848 = vmatprep.subr.bf16.mxu0 %v2531_v4 }
 0x7d4   : > { %v2124_v43 = vpop.eup %2123 }
 0x7d5   : > { %v897_v44 = vmul.f32 %v2124_v43, %v2122_v36 }
 0x7d7   : > { %v898_v45 = vpack.c.bf16 %v897_v44, %v897_v44  ;;  %v2101_v44 = vld [vmem:[#allocation11] sm:$0xff]  }
 0x7d9   : > { %1845 = vmatmul.mubr.msk.bf16.vlgmr.msra.gmra.mrb[16].mxu0 %vm676_vm4, %v898_v45  ;;  %v1102_v46 = vpop.f32.mrb[12].mxu1 }
 0x7da   : > { %v1864_v47 = vpop.f32.mrb[13].mxu1  ;;  %1850 = vmatprep.mubr.msk.bf16.mxu0 %vm2532_vm1, %v2531_v4  ;;  %1849 = vmatpush3.bf16.msra.mxu0 %v954_v57  ;;  %v1108_v6 = vpack.c.bf16 %v1102_v46, %v1102_v46  ;;  %v2102_v46 = vld [vmem:[#allocation11 + $0x8] sm:$0xff]  }
 0x7db   : > { %v1105_v48 = vpop.f32.mrb[14].mxu1  ;;  %1866 = vmatprep.subr.bf16.mxu0 %v2531_v4  ;;  %v2103_v47 = vld [vmem:[#allocation11 + $0x10] sm:$0xff]  }
 0x7dc   : > { %v1865_v49 = vpop.f32.mrb[15].mxu1  ;;  %v2104_v48 = vld [vmem:[#allocation11 + $0x18] sm:$0xff]  }
 0x7dd   : > { %v2105_v49 = vld [vmem:[#allocation11 + $0x20] sm:$0xff]  }
 0x7e1   : > { %v1202_v50 = vpop.f32.mrb[16].mxu1 }
 0x7e2   : > { %v1208_v51 = vsel %vm675_vm6, %v1202_v50, -3.4028235e+38  ;;  %v1876_v52 = vpop.f32.mrb[17].mxu1  ;;  %v2106_v50 = vld [vmem:[#allocation11 + $0x28] sm:$0xff]  }
 0x7e3   : > { %v1205_v53 = vpop.f32.mrb[18].mxu1  ;;  %v1209_v54 = vsel %vm676_vm4, %v1208_v51, -inf  ;;  %v2108_v52 = vld [vmem:[#allocation11 + $0x38] sm:$0xff]  }
 0x7e4   : > { %1210 = vmax.xlane.f32.xlu1 %v1209_v54  ;;  %v1877_v55 = vpop.f32.mrb[19].mxu1 }
 0x871   : > { %v1211_v58 = vpop.xlane.xlu1 %1210 }
 0x872   : > { %v1212_v59 = vsub.f32 %v1208_v51, %v1211_v58  ;;  %v2107_v51 = vld [vmem:[#allocation11 + $0x30] sm:$0xff]  }
 0x874   : > { %v1213_v60 = vmul.f32 1.442695, %v1212_v59 }
 0x876   : > { %2125 = vpow2.f32 %v1213_v60 }
 0x880   : > { %v2126_v61 = vpop.eup %2125 }
 0x881   : > { %v1215_v38 = vsel %vm676_vm4, %v2126_v61, 0.0 }
 0x882   : > { %1216 = vadd.xlane.f32.xlu1 %v1215_v38 }
 0x893   : > { %1221 = vrot.lane.b32.xlu1 %v2979_v28, %s2539_s29 }
 0x8ac   : > { %v941_v62 = vpop.f32.mrb[16].mxu0 }
 0x8ad   : > { %v947_v63 = vpack.c.bf16 %v941_v62, %v941_v62  ;;  %v1846_v1 = vpop.f32.mrb[17].mxu0 }
 0x8ae   : > { %v944_v3 = vpop.f32.mrb[18].mxu0 }
 0x8af   : > { %v1847_v5 = vpop.f32.mrb[19].mxu0  ;;  %1851 = vmatmul.mubr.msk.bf16.vlgmr.msra.gmra.mrb[12].mxu0 %vm676_vm4, %v947_v63 }
 0x8b0   : > { %1867 = vmatpush3.bf16.msra.mxu0 %v1115_v2  ;;  %1868 = vmatprep.mubr.msk.bf16.mxu0 %vm2532_vm1, %v2531_v4 }
 0x8b1   : > { %1878 = vmatprep.subr.bf16.mxu0 %v2531_v4 }
 0x8bb   : > { %1869 = vmatmul.mubr.msk.bf16.vlgmr.msra.gmra.mrb[12].mxu0 %vm676_vm4, %v1108_v6 }
 0x8bc   : > { %1880 = vmatprep.mubr.msk.bf16.mxu0 %vm2532_vm1, %v2531_v4 }
 0x90f   : > { %v1217_v28 = vpop.xlane.xlu1 %1216 }
 0x910   : > { %2127 = vrcp.f32 %v1217_v28 }
 0x913   : > { %v1222_v7 = vpop.permute.xlu1 %1221 }
 0x914   : > { %v1227_v8 = vsel %vm742_vm5, %v1222_v7, 0 }
 0x915   : > { %1879 = vmatpush3.bf16.msra.mxu0 %v1227_v8 }
 0x916   : > { %1884 = vmatprep.subr.bf16.mxu0 %v2531_v4 }
 0x91a   : > { %v2128_v9 = vpop.eup %2127 }
 0x91b   : > { %v1219_v11 = vmul.f32 %v2128_v9, %v2126_v61 }
 0x91d   : > { %v1220_v12 = vpack.c.bf16 %v1219_v11, %v1219_v11 }
 0x91f   : > { %1881 = vmatmul.mubr.msk.bf16.vlgmr.msra.gmra.mrb[20].mxu0 %vm676_vm4, %v1220_v12 }
 0x920   : > { %1885 = vmatpush3.bf16.msra.mxu0 %v1276_v13  ;;  %1886 = vmatprep.mubr.msk.bf16.mxu0 %vm2532_vm1, %v2531_v4 }
 0x9f2   : > { %v1263_v14 = vpop.f32.mrb[20].mxu0 }
 0x9f3   : > { %v1269_v15 = vpack.c.bf16 %v1263_v14, %v1263_v14  ;;  %v1882_v16 = vpop.f32.mrb[21].mxu0 }
 0x9f4   : > { %v1266_v17 = vpop.f32.mrb[22].mxu0 }
 0x9f5   : > { %v1883_v18 = vpop.f32.mrb[23].mxu0  ;;  %1887 = vmatmul.mubr.msk.bf16.vlgmr.msra.gmra.mrb[12].mxu0 %vm676_vm4, %v1269_v15 }
 0xac8   : > { %v1312_v19 = vpop.f32.mrb[12].mxu0 }
 0xac9   : > { %v3079_v20 = vadd.f32 %v1312_v19, %v2957_v0  ;;  %v1888_v21 = vpop.f32.mrb[13].mxu0 }
 0xaca   : > { %v1315_v22 = vpop.f32.mrb[14].mxu0 }
 0xacb   : > { %v1889_v23 = vpop.f32.mrb[15].mxu0  ;;  %v1319_v24 = vmul.f32 %v3079_v20, %v3079_v20 }
 0xacd   : > { %v1320_v25 = vsel %vm520_vm0, %v1319_v24, 0.0 }
 0xace   : > { %1321 = vadd.xlane.f32.xlu0 %v1320_v25 }
 0xb5b   : > { %v1322_v29 = vpop.xlane.xlu0 %1321 }
 0xb5c   : > { %v1323_v0 = vmul.f32 0.03125, %v1322_v29 }
 0xb5e   : > { %2129 = vrsqrt.f32 %v1323_v0  ;;  %vm1326_vm7 = vcmp.eq.f32.partialorder %v1323_v0, inf  ;;  %v1329_v32 = vand.u32 2147483648, %v1323_v0  ;;  %vm1328_vm8 = vcmp.eq.f32.partialorder %v1323_v0, 0.0 }
 0xb68   : > { %v2130_v30 = vpop.eup %2129 }
 0xb69   : > { %v1325_v31 = vmul.f32 %v2130_v30, %v1323_v0 }
 0xb6b   : > { %v1327_v33 = vsel %vm1326_vm7, %v1323_v0, %v1325_v31 }
 0xb6c   : > { %v1330_v34 = vsel %vm1328_vm8, %v1329_v32, %v1327_v33 }
 0xb6d   : > { %v1331_v35 = vadd.f32 1e-08, %v1330_v34 }
 0xb6f   : > { %2131 = vrcp.f32 %v1331_v35 }
 0xb79   : > { %v2132_v36 = vpop.eup %2131 }
 0xb7a   : > { %v1333_v40 = vmul.f32 %v2132_v36, %v3079_v20 }
 0xb7c   : > { %v1340_v42 = vmul.f32 %v1743_v37, %v1333_v40 }
 0xb7e   : > { %v1347_v43 = vadd.f32 %v1744_v41, %v1340_v42 }
 0xb80   : > { %v1348_v45 = vpack.c.bf16 %v1347_v43, %v1347_v43 }
 0xb82   : > { %1895 = vmatmul.mubr.msk.bf16.vlgmr.msra.gmra.mrb[20].mxu1 %vm520_vm0, %v1348_v45 }
 0xb83   : > { %1899 = vmatpush3.bf16.msra.mxu1 %v2101_v44  ;;  %1914 = vmatprep.mubr.msk.bf16.mxu1 %vm2532_vm1, %v2531_v4 }
 0xb84   : > { %1900 = vmatprep.subr.bf16.mxu1 %v2531_v4 }
 0xb87   : > { %1901 = vmatpush3.bf16.msra.mxu1 %v2102_v46 }
 0xb88   : > { %1902 = vmatprep.subr.bf16.mxu1 %v2531_v4 }
 0xb8b   : > { %1903 = vmatpush3.bf16.msra.mxu1 %v2103_v47 }
 0xb8c   : > { %1904 = vmatprep.subr.bf16.mxu1 %v2531_v4 }
 0xb8f   : > { %1905 = vmatpush3.bf16.msra.mxu1 %v2104_v48 }
 0xb90   : > { %1906 = vmatprep.subr.bf16.mxu1 %v2531_v4 }
 0xb93   : > { %1907 = vmatpush3.bf16.msra.mxu1 %v2105_v49 }
 0xb94   : > { %1908 = vmatprep.subr.bf16.mxu1 %v2531_v4 }
 0xb97   : > { %1909 = vmatpush3.bf16.msra.mxu1 %v2106_v50 }
 0xb98   : > { %1910 = vmatprep.subr.bf16.mxu1 %v2531_v4 }
 0xb9b   : > { %1911 = vmatpush3.bf16.msra.mxu1 %v2107_v51 }
 0xb9c   : > { %1912 = vmatprep.subr.bf16.mxu1 %v2531_v4 }
 0xb9f   : > { %1913 = vmatpush3.bf16.msra.mxu1 %v2108_v52 }
 0xc55   : > { %v1402_v53 = vpop.f32.mrb[20].mxu1 }
 0xc56   : > { %v1408_v54 = vmax.f32 %v1402_v53, 0.0  ;;  %v1896_v55 = vpop.f32.mrb[21].mxu1 }
 0xc57   : > { %v1405_v56 = vpop.f32.mrb[22].mxu1 }
 0xc58   : > { %v1409_v57 = vpack.c.bf16 %v1408_v54, %v1408_v54  ;;  %v1897_v58 = vpop.f32.mrb[23].mxu1 }
 0xc5a   : > { %1915 = vmatmul.mubr.bf16.vlgmr.msra.gmra.mrb[24].mxu1 %v1409_v57 }
 0xd2d   : > { %v1508_v59 = vpop.f32.mrb[24].mxu1 }
 0xd2e   : > { %v1514_v60 = vadd.f32 %v3079_v20, %v1508_v59  ;;  %v1916_v61 = vpop.f32.mrb[25].mxu1 }
 0xd2f   : > { %v1511_v4 = vpop.f32.mrb[26].mxu1 }
 0xd30   : > { %v1917_v38 = vpop.f32.mrb[27].mxu1  ;;  %1515 = vst.msk [vmem:[%s511_s23] sm:$0xff] %vm520_vm0, %v1514_v60 }
 0xd31   : > { %2428 = shalt.err (!%p2425_p8)
}
 0xd32   : > { %s2429_s26 = scalar_lea.hbm %s3104_s20, 128  ;;  %s2433_s19 = scalar_lea.hbm %s3200_s2, 256 }
 0xd33   : > { %p2430_p3 = scmp.ne.s32.totalorder %s3104_s20, %s2429_s26  ;;  %p2434_p0 = scmp.lt.u32.totalorder %s3104_s20, %s3200_s2 }
 0xd34   : > { %p2435_p11 = scmp.lt.u32.totalorder %s2433_s19, %s2429_s26  ;;  %p2437_p6 = scmp.lt.u32.totalorder %s2429_s26, %s3104_s20 }
 0xd35   : > { %p2431_p12 = pnand %p2430_p3, %p3201_p5 }
 0xd36   : > { %p2436_p7 = por %p2435_p11, %p2434_p0 }
 0xd37   : > { %p2432_p13 = pneg %p2431_p12 }
 0xd38   : > { %p2438_p10 = por %p2437_p6, %p2436_p7 }
 0xd3a   : > { %p2439_p1 = pnand %p2438_p10, %p2432_p13 }
 0xd3c   : > { %2442 = shalt.err (!%p2439_p1)
}
 0xd3d   : > { %1969 = dma.vmem_to_hbm [thread:$0]  (%p3201_p5), %s3106_s3, 128, %s3104_s20, %s1517_s28  }
 0xd3e PF: > { %s1543_s0 = sand.u32 1, %s2497_s13   ;;  %p3202_p2 = scmp.ne.s32.totalorder %s3192_s27, 0 }
 0xd3f   : > { %p3203_p4 = scmp.ge.s32.totalorder %s2517_s18, 2  ;;  %s1544_s1 = scalar_lea.sflag [#allocation4], %s1543_s0 }
 0xd41   : > { %p2004_p9 = pnand %p3203_p4, %p3202_p2 }
 0xd43   : > { %2492 = dma.done.wait (!%p2004_p9), %s1544_s1, 128  }
 0xd44   : > { %2494 = vsyncadd (!%p2004_p9), %s1544_s1, 4294967168  ;;  %s31_s18 = sadd.s32 1, %s2517_s18   ;;  %s3204_s13 = smov %s2501_s14 }
 0xd45   : > { %p28_p8 = scmp.ge.s32.totalorder %s31_s18, 4   ;;  %s3205_s14 = smov %s2505_s15 }
 0xd46   : > { %s3206_s15 = smov %s2878_s25  ;;  %s3207_s16 = smov %s2513_s17 }
 0xd47   : > { %s3208_s17 = smov %s3210_s30  ;;  %30 = sbr.rel (!%p28_p8) target bundleno = 17 (0x11), region = 144 }
 0xd4e   :  { %1549 = vsyncpa [#allocation3], 1 }
 0xd4f   :  { %1551 = vsyncpa [#allocation3 + $0x1], 1 }
 0xd50   :  { %1552 = vsyncpa [#allocation6], 1 }
 0xd51   :  { %1553 = vsyncpa [#allocation9], 1 }
 0xd52   :  { %1554 = vsyncpa [#allocation12], 1 }
 0xd53   :  { %1555 = vsyncpa [#allocation15], 1 }
 0xd54   :  { %1556 = vsyncpa [#allocation18], 1 }
 0xd55   :  { %1557 = vsyncpa [#allocation4], 1 }
 0xd56   :  { %1559 = vsyncpa [#allocation4 + $0x1], 1 }

</bundles_post_ra>
